<compile_context>
chip_gen: v7x
topology: tpu7x:2x2x1
jax: 0.10.0
libtpu: 0.0.40
codegen_flags: <defaults>
</compile_context>

<pallas_src>
import functools

import jax
import jax.numpy as jnp
from jax.experimental import pallas as pl
from jax.experimental.pallas import tpu as pltpu

_EPS = 1e-5  # nn.InstanceNorm2d default


# ---------------------------------------------------------------------------
# Pallas kernels
# ---------------------------------------------------------------------------

def _conv_in_prelu_kernel(p_ref, w_ref, b_ref, a_ref, o_ref, *, eps):
    """One batch element: y = patches @ W + b ; InstanceNorm ; PReLU.

    p_ref: [1, S, K] bf16   (S = H_out*W_out, K = 9*C_in)
    w_ref: [K, C]    bf16
    b_ref: [1, C]    f32
    a_ref: [1, 1]    f32 (SMEM)  PReLU slope
    o_ref: [1, S, C] f32
    """
    y = jnp.dot(p_ref[0], w_ref[...], preferred_element_type=jnp.float32)
    y = y + b_ref[...]
    mu = jnp.mean(y, axis=0, keepdims=True)
    var = jnp.mean(jnp.square(y - mu), axis=0, keepdims=True)
    y = (y - mu) * jax.lax.rsqrt(var + eps)
    a = a_ref[0, 0]
    y = jnp.where(y > 0, y, a * y)
    o_ref[0] = y.astype(o_ref.dtype)


def _resunit_tail_kernel(*refs, eps, apply_norm_act):
    """One batch element: conv2 (+IN+PReLU unless conv-only) + residual conv + add."""
    if apply_norm_act:
        p2_ref, w2_ref, b2_ref, pr_ref, wr_ref, br_ref, a_ref, o_ref = refs
    else:
        p2_ref, w2_ref, b2_ref, pr_ref, wr_ref, br_ref, o_ref = refs
    y = jnp.dot(p2_ref[0], w2_ref[...], preferred_element_type=jnp.float32)
    y = y + b2_ref[...]
    if apply_norm_act:
        mu = jnp.mean(y, axis=0, keepdims=True)
        var = jnp.mean(jnp.square(y - mu), axis=0, keepdims=True)
        y = (y - mu) * jax.lax.rsqrt(var + eps)
        a = a_ref[0, 0]
        y = jnp.where(y > 0, y, a * y)
    res = jnp.dot(pr_ref[0], wr_ref[...], preferred_element_type=jnp.float32)
    res = res + br_ref[...]
    o_ref[0] = (y + res).astype(o_ref.dtype)


def _linear_sigmoid_kernel(x_ref, w_ref, b_ref, o_ref):
    """sigmoid(x @ W + b); W/b are lane-padded to 128 output columns."""
    y = jnp.dot(x_ref[...], w_ref[...], preferred_element_type=jnp.float32)
    y = y + b_ref[...]
    o_ref[...] = 1.0 / (1.0 + jnp.exp(-y))


# ---------------------------------------------------------------------------
# pallas_call wrappers
# ---------------------------------------------------------------------------

def _conv_in_prelu(patches, w_mat, b_row, alpha, *, eps=_EPS):
    B, S, K = patches.shape
    C = w_mat.shape[1]
    kernel = functools.partial(_conv_in_prelu_kernel, eps=eps)
    return pl.pallas_call(
        kernel,
        out_shape=jax.ShapeDtypeStruct((B, S, C), jnp.float32),
        grid=(B,),
        in_specs=[
            pl.BlockSpec((1, S, K), lambda i: (i, 0, 0)),
            pl.BlockSpec((K, C), lambda i: (0, 0)),
            pl.BlockSpec((1, C), lambda i: (0, 0)),
            pl.BlockSpec(memory_space=pltpu.MemorySpace.SMEM),
        ],
        out_specs=pl.BlockSpec((1, S, C), lambda i: (i, 0, 0)),
        compiler_params=pltpu.CompilerParams(dimension_semantics=("parallel",)),
    )(patches, w_mat, b_row, alpha)


def _resunit_tail(p2, w2, b2, pr, wr, br, alpha, *, apply_norm_act, eps=_EPS):
    B, S, K2 = p2.shape
    Kr = pr.shape[2]
    C = w2.shape[1]
    kernel = functools.partial(_resunit_tail_kernel, eps=eps,
                               apply_norm_act=apply_norm_act)
    in_specs = [
        pl.BlockSpec((1, S, K2), lambda i: (i, 0, 0)),
        pl.BlockSpec((K2, C), lambda i: (0, 0)),
        pl.BlockSpec((1, C), lambda i: (0, 0)),
        pl.BlockSpec((1, S, Kr), lambda i: (i, 0, 0)),
        pl.BlockSpec((Kr, C), lambda i: (0, 0)),
        pl.BlockSpec((1, C), lambda i: (0, 0)),
    ]
    args = [p2, w2, b2, pr, wr, br]
    if apply_norm_act:
        in_specs.append(pl.BlockSpec(memory_space=pltpu.MemorySpace.SMEM))
        args.append(alpha)
    return pl.pallas_call(
        kernel,
        out_shape=jax.ShapeDtypeStruct((B, S, C), jnp.float32),
        grid=(B,),
        in_specs=in_specs,
        out_specs=pl.BlockSpec((1, S, C), lambda i: (i, 0, 0)),
        compiler_params=pltpu.CompilerParams(dimension_semantics=("parallel",)),
    )(*args)


def _linear_sigmoid(feats, w_pad, b_pad):
    B, F = feats.shape
    N = w_pad.shape[1]
    return pl.pallas_call(
        _linear_sigmoid_kernel,
        out_shape=jax.ShapeDtypeStruct((B, N), jnp.float32),
        in_specs=[
            pl.BlockSpec((B, F), lambda: (0, 0)),
            pl.BlockSpec((F, N), lambda: (0, 0)),
            pl.BlockSpec((1, N), lambda: (0, 0)),
        ],
        out_specs=pl.BlockSpec((B, N), lambda: (0, 0)),
    )(feats, w_pad, b_pad)


# ---------------------------------------------------------------------------
# Layout helpers (pure data movement, plain JAX)
# ---------------------------------------------------------------------------

def _same_out(size, stride, k=3, pad=1):
    return (size + 2 * pad - k) // stride + 1


def _im2col(x, stride):
    """x: [B, H, W, C] f32 -> [B, Ho*Wo, 9*C]; 3x3 kernel, padding 1 (PyTorch samePadding).

    # TODO(synk): patch extraction is plain-JAX data movement; a fully in-kernel
    # conv would shift/accumulate directly inside VMEM instead.
    """
    B, H, W, C = x.shape
    xp = jnp.pad(x, ((0, 0), (1, 1), (1, 1), (0, 0)))
    Ho = _same_out(H, stride)
    Wo = _same_out(W, stride)
    cols = []
    for ky in range(3):
        for kx in range(3):
            cols.append(xp[:, ky:ky + stride * (Ho - 1) + 1:stride,
                            kx:kx + stride * (Wo - 1) + 1:stride, :])
    return jnp.concatenate(cols, axis=-1).reshape(B, Ho * Wo, 9 * C)


def _conv_w_to_mat(w):
    """PyTorch OIHW [Cout, Cin, 3, 3] -> [9*Cin, Cout], matching _im2col order."""
    cout, cin, kh, kw = w.shape
    return jnp.transpose(w, (2, 3, 1, 0)).reshape(kh * kw * cin, cout)


# ---------------------------------------------------------------------------
# Model
# ---------------------------------------------------------------------------

class DiscriminatorPallas:
    """JAX/Pallas port of the PyTorch Discriminator forward pass (eval mode).

    Each layer is a ResidualUnit2D(subunits=2):
        Conv3x3(stride s) -> InstanceNorm -> PReLU,
        Conv3x3(stride 1) -> [InstanceNorm -> PReLU unless last layer],
      + strided 3x3 residual conv, summed.
    Followed by flatten (NCHW order, like torch x.view(b, -1)), Linear(->1),
    sigmoid.  InstanceNorm2d has no affine params (PyTorch default); dropout=0.
    """

    def __init__(self, in_shape, channels, strides, key, kernel_size=3, bias=True):
        assert kernel_size == 3, "demo config uses 3x3 convs"
        self.in_h, self.in_w, self.in_c = in_shape
        self.layers_raw = []   # PyTorch-layout params (for the pure-JAX reference)
        self.layers_dev = []   # kernel-ready (transposed / bf16) params

        cin = self.in_c
        h, w = self.in_h, self.in_w
        n_layers = len(channels)
        for i, (cout, s) in enumerate(zip(channels, strides)):
            # TODO(synk): identity / 1x1-residual variants (stride==1) not
            # implemented; this config uses strided units (3x3 residual conv).
            assert s != 1 or cin != cout, "unsupported residual variant in demo"
            assert s != 1, "demo config uses strided residual units"
            key, *ks = jax.random.split(key, 7)
            raw = dict(
                w1=jax.random.normal(ks[0], (cout, cin, 3, 3), jnp.float32) * 0.1,
                b1=jax.random.normal(ks[1], (cout,), jnp.float32) * 0.1,
                a1=jnp.asarray(0.25, jnp.float32),   # PyTorch PReLU default init
                w2=jax.random.normal(ks[2], (cout, cout, 3, 3), jnp.float32) * 0.1,
                b2=jax.random.normal(ks[3], (cout,), jnp.float32) * 0.1,
                a2=jnp.asarray(0.25, jnp.float32),
                wr=jax.random.normal(ks[4], (cout, cin, 3, 3), jnp.float32) * 0.1,
                br=jax.random.normal(ks[5], (cout,), jnp.float32) * 0.1,
                stride=s,
                is_last=(i == n_layers - 1),
            )
            dev = dict(
                w1=_conv_w_to_mat(raw["w1"]).astype(jnp.bfloat16),
                b1=raw["b1"].reshape(1, cout),
                a1=jnp.full((1, 1), 0.25, jnp.float32),
                w2=_conv_w_to_mat(raw["w2"]).astype(jnp.bfloat16),
                b2=raw["b2"].reshape(1, cout),
                a2=None if raw["is_last"] else jnp.full((1, 1), 0.25, jnp.float32),
                wr=_conv_w_to_mat(raw["wr"]).astype(jnp.bfloat16),
                br=raw["br"].reshape(1, cout),
                stride=s,
                is_last=raw["is_last"],
            )
            self.layers_raw.append(raw)
            self.layers_dev.append(dev)
            cin = cout
            h, w = _same_out(h, s), _same_out(w, s)

        self.final_h, self.final_w, self.final_c = h, w, cin
        feat = h * w * cin
        key, kl1, kl2 = jax.random.split(key, 3)
        self.wl = jax.random.normal(kl1, (feat, 1), jnp.float32) * 0.1
        self.bl = jax.random.normal(kl2, (1,), jnp.float32) * 0.1
        # lane-dense (128-wide) padded copies for the fused linear+sigmoid kernel
        self.wl_pad = jnp.pad(self.wl, ((0, 0), (0, 127))).astype(jnp.bfloat16)
        self.bl_pad = jnp.pad(self.bl.reshape(1, 1), ((0, 0), (0, 127)))

    def __call__(self, x_nchw):
        B = x_nchw.shape[0]
        x = jnp.transpose(x_nchw.astype(jnp.float32), (0, 2, 3, 1))  # NHWC, C on lanes
        for L in self.layers_dev:
            _, H, W, _ = x.shape
            s = L["stride"]
            Ho, Wo = _same_out(H, s), _same_out(W, s)
            Cout = L["w1"].shape[1]

            # subunit 0: conv(stride s) + InstanceNorm + PReLU, fused.
            # (the residual conv shares kernel/stride/padding, so p1 is reused)
            p1 = _im2col(x, s).astype(jnp.bfloat16)
            y1 = _conv_in_prelu(p1, L["w1"], L["b1"], L["a1"])
            y1 = y1.reshape(B, Ho, Wo, Cout)

            # subunit 1 (+ optional IN/PReLU) + residual conv + add, fused.
            p2 = _im2col(y1, 1).astype(jnp.bfloat16)
            out = _resunit_tail(p2, L["w2"], L["b2"], p1, L["wr"], L["br"],
                                L["a2"], apply_norm_act=not L["is_last"])
            x = out.reshape(B, Ho, Wo, Cout)

        # flatten exactly like torch `x.view(b, -1)` on an NCHW tensor
        feats = jnp.transpose(x, (0, 3, 1, 2)).reshape(B, -1).astype(jnp.bfloat16)
        sig = _linear_sigmoid(feats, self.wl_pad, self.bl_pad)[:, :1]
        return (sig,)


# ---------------------------------------------------------------------------
# Pure-JAX reference (lax.conv) with matched bf16-matmul / f32-epilogue precision
# ---------------------------------------------------------------------------

def _conv2d_ref(x, w, b, stride):
    y = jax.lax.conv_general_dilated(
        x.astype(jnp.bfloat16), w.astype(jnp.bfloat16),
        window_strides=(stride, stride), padding=((1, 1), (1, 1)),
        dimension_numbers=("NCHW", "OIHW", "NCHW"),
        preferred_element_type=jnp.float32)
    return y + b.reshape(1, -1, 1, 1)


def _instance_norm_ref(x, eps=_EPS):
    mu = jnp.mean(x, axis=(2, 3), keepdims=True)
    var = jnp.mean(jnp.square(x - mu), axis=(2, 3), keepdims=True)
    return (x - mu) * jax.lax.rsqrt(var + eps)


def _prelu_ref(x, a):
    return jnp.where(x > 0, x, a * x)


def _reference_forward(model, x_nchw):
    x = x_nchw.astype(jnp.float32)
    for L in model.layers_raw:
        res = _conv2d_ref(x, L["wr"], L["br"], L["stride"])
        y = _conv2d_ref(x, L["w1"], L["b1"], L["stride"])
        y = _prelu_ref(_instance_norm_ref(y), L["a1"])
        y = _conv2d_ref(y, L["w2"], L["b2"], 1)
        if not L["is_last"]:
            y = _prelu_ref(_instance_norm_ref(y), L["a2"])
        x = y + res
    feats = x.reshape(x.shape[0], -1)
    logits = jnp.dot(feats.astype(jnp.bfloat16), model.wl.astype(jnp.bfloat16),
                     preferred_element_type=jnp.float32) + model.bl
    return 1.0 / (1.0 + jnp.exp(-logits))


# ---------------------------------------------------------------------------

if __name__ == "__main__":
    key = jax.random.PRNGKey(0)
    key, kx, kp = jax.random.split(key, 3)

    # NCHW input matching Discriminator(inShape=(16,16,4), channels=[8,16], strides=[2,2])
    x = jax.random.normal(kx, (2, 4, 16, 16), jnp.float32)

    model = DiscriminatorPallas(in_shape=(16, 16, 4), channels=(8, 16),
                                strides=(2, 2), key=kp)

    fwd = jax.jit(lambda inp: model(inp)[0])
    out = jax.block_until_ready(fwd(x))

    ref = _reference_forward(model, x)
    assert out.shape == (2, 1), out.shape
    assert bool(jnp.all(jnp.isfinite(out)))
    assert jnp.allclose(out, ref, atol=5e-3, rtol=5e-3), (out, ref)

    print("KERNEL_OK")
</pallas_src>

<mosaic_0001>
module attributes {stable_mosaic.version = 11 : i64} {
  func.func @_conv_in_prelu_kernel(%arg0: i32, %arg1: memref<1x64x36xbf16, #tpu.memory_space<vmem>>, %arg2: memref<36x8xbf16, #tpu.memory_space<vmem>>, %arg3: memref<1x8xf32, #tpu.memory_space<vmem>>, %arg4: memref<1x1xf32, #tpu.memory_space<smem>>, %arg5: memref<1x64x8xf32, #tpu.memory_space<vmem>>) attributes {dimension_semantics = [#tpu.dimension_semantics<parallel>], iteration_bounds = array<i64: 2>, scalar_prefetch = 0 : i64, scratch_operands = 0 : i64, tpu.core_type = #tpu.core_type<tc>, window_params = [{transform_indices = @transform_0, window_bounds = array<i64: 1, 64, 36>}, {pipeline_mode = #tpu.pipeline_mode<synchronous>, transform_indices = @transform_1, window_bounds = array<i64: 36, 8>}, {pipeline_mode = #tpu.pipeline_mode<synchronous>, transform_indices = @transform_2, window_bounds = array<i64: 1, 8>}, {transform_indices = @transform_3, window_bounds = array<i64: 1, 1>}, {transform_indices = @transform_4, window_bounds = array<i64: 1, 64, 8>}]} {
    %c0 = arith.constant 0 : index
    %c0_0 = arith.constant 0 : index
    %c0_1 = arith.constant 0 : index
    %0 = vector.load %arg1[%c0, %c0_0, %c0_1] : memref<1x64x36xbf16, #tpu.memory_space<vmem>>, vector<1x64x36xbf16>
    %1 = vector.shape_cast %0 : vector<1x64x36xbf16> to vector<64x36xbf16>
    %c0_2 = arith.constant 0 : index
    %c0_3 = arith.constant 0 : index
    %2 = vector.load %arg2[%c0_2, %c0_3] : memref<36x8xbf16, #tpu.memory_space<vmem>>, vector<36x8xbf16>
    %cst = arith.constant dense<0.000000e+00> : vector<64x8xf32>
    %3 = tpu.matmul %1, %2, %cst {dimension_numbers = #tpu.dot_dimension_numbers<[1], [0], [0], [1], [0, 0, 1, 1], [], []>} : vector<64x36xbf16>, vector<36x8xbf16>, vector<64x8xf32> -> vector<64x8xf32>
    %c0_4 = arith.constant 0 : index
    %c0_5 = arith.constant 0 : index
    %4 = vector.load %arg3[%c0_4, %c0_5] : memref<1x8xf32, #tpu.memory_space<vmem>>, vector<1x8xf32>
    %5 = vector.broadcast %4 : vector<1x8xf32> to vector<64x8xf32>
    %6 = arith.addf %3, %5 : vector<64x8xf32>
    %cst_6 = arith.constant dense<0.000000e+00> : vector<8xf32>
    %7 = vector.multi_reduction <add>, %6, %cst_6 [0] : vector<64x8xf32> to vector<8xf32>
    %8 = vector.shape_cast %7 : vector<8xf32> to vector<1x8xf32>
    %cst_7 = arith.constant 6.400000e+01 : f32
    %9 = vector.broadcast %cst_7 : f32 to vector<1x8xf32>
    %10 = arith.divf %8, %9 : vector<1x8xf32>
    %11 = vector.broadcast %10 : vector<1x8xf32> to vector<64x8xf32>
    %12 = arith.subf %6, %11 : vector<64x8xf32>
    %13 = arith.mulf %12, %12 : vector<64x8xf32>
    %cst_8 = arith.constant dense<0.000000e+00> : vector<8xf32>
    %14 = vector.multi_reduction <add>, %13, %cst_8 [0] : vector<64x8xf32> to vector<8xf32>
    %15 = vector.shape_cast %14 : vector<8xf32> to vector<1x8xf32>
    %cst_9 = arith.constant 6.400000e+01 : f32
    %16 = vector.broadcast %cst_9 : f32 to vector<1x8xf32>
    %17 = arith.divf %15, %16 : vector<1x8xf32>
    %18 = vector.broadcast %10 : vector<1x8xf32> to vector<64x8xf32>
    %19 = arith.subf %6, %18 : vector<64x8xf32>
    %cst_10 = arith.constant 9.99999974E-6 : f32
    %20 = vector.broadcast %cst_10 : f32 to vector<1x8xf32>
    %21 = arith.addf %17, %20 : vector<1x8xf32>
    %22 = math.rsqrt %21 : vector<1x8xf32>
    %23 = vector.broadcast %22 : vector<1x8xf32> to vector<64x8xf32>
    %24 = arith.mulf %19, %23 : vector<64x8xf32>
    %c0_11 = arith.constant 0 : index
    %c0_12 = arith.constant 0 : index
    %25 = memref.load %arg4[%c0_11, %c0_12] : memref<1x1xf32, #tpu.memory_space<smem>>
    %cst_13 = arith.constant 0.000000e+00 : f32
    %26 = vector.broadcast %cst_13 : f32 to vector<64x8xf32>
    %27 = arith.cmpf ogt, %24, %26 : vector<64x8xf32>
    %28 = vector.broadcast %25 : f32 to vector<64x8xf32>
    %29 = arith.mulf %28, %24 : vector<64x8xf32>
    %30 = arith.select %27, %24, %29 : vector<64x8xi1>, vector<64x8xf32>
    %c0_14 = arith.constant 0 : index
    %c0_15 = arith.constant 0 : index
    %c0_16 = arith.constant 0 : index
    %31 = vector.load %arg5[%c0_14, %c0_15, %c0_16] : memref<1x64x8xf32, #tpu.memory_space<vmem>>, vector<1x64x8xf32>
    %32 = vector.shape_cast %31 : vector<1x64x8xf32> to vector<64x8xf32>
    %33 = vector.shape_cast %30 : vector<64x8xf32> to vector<1x64x8xf32>
    tpu.vector_store %arg5[%c0_14, %c0_15, %c0_16], %33 {strides = array<i32>} : memref<1x64x8xf32, #tpu.memory_space<vmem>>, vector<1x64x8xf32>,
    return
  }
  func.func @transform_0(%arg0: i32) -> (i32, i32, i32) {
    %c0_i32 = arith.constant 0 : i32
    %c0_i32_0 = arith.constant 0 : i32
    %c0_i32_1 = arith.constant 0 : i32
    return %arg0, %c0_i32, %c0_i32_0 : i32, i32, i32
  }
  func.func @transform_1(%arg0: i32) -> (i32, i32) {
    %c0_i32 = arith.constant 0 : i32
    %c0_i32_0 = arith.constant 0 : i32
    %c0_i32_1 = arith.constant 0 : i32
    return %c0_i32, %c0_i32_0 : i32, i32
  }
  func.func @transform_2(%arg0: i32) -> (i32, i32) {
    %c0_i32 = arith.constant 0 : i32
    %c0_i32_0 = arith.constant 0 : i32
    %c0_i32_1 = arith.constant 0 : i32
    return %c0_i32, %c0_i32_0 : i32, i32
  }
  func.func @transform_3(%arg0: i32) -> (i32, i32) {
    %c0_i32 = arith.constant 0 : i32
    %c0_i32_0 = arith.constant 0 : i32
    %c0_i32_1 = arith.constant 0 : i32
    return %c0_i32, %c0_i32_0 : i32, i32
  }
  func.func @transform_4(%arg0: i32) -> (i32, i32, i32) {
    %c0_i32 = arith.constant 0 : i32
    %c0_i32_0 = arith.constant 0 : i32
    %c0_i32_1 = arith.constant 0 : i32
    return %arg0, %c0_i32, %c0_i32_0 : i32, i32, i32
  }
}

module attributes {stable_mosaic.version = 11 : i64} {
  func.func @_resunit_tail_kernel(%arg0: i32, %arg1: memref<1x64x72xbf16, #tpu.memory_space<vmem>>, %arg2: memref<72x8xbf16, #tpu.memory_space<vmem>>, %arg3: memref<1x8xf32, #tpu.memory_space<vmem>>, %arg4: memref<1x64x36xbf16, #tpu.memory_space<vmem>>, %arg5: memref<36x8xbf16, #tpu.memory_space<vmem>>, %arg6: memref<1x8xf32, #tpu.memory_space<vmem>>, %arg7: memref<1x1xf32, #tpu.memory_space<smem>>, %arg8: memref<1x64x8xf32, #tpu.memory_space<vmem>>) attributes {dimension_semantics = [#tpu.dimension_semantics<parallel>], iteration_bounds = array<i64: 2>, scalar_prefetch = 0 : i64, scratch_operands = 0 : i64, tpu.core_type = #tpu.core_type<tc>, window_params = [{transform_indices = @transform_0, window_bounds = array<i64: 1, 64, 72>}, {pipeline_mode = #tpu.pipeline_mode<synchronous>, transform_indices = @transform_1, window_bounds = array<i64: 72, 8>}, {pipeline_mode = #tpu.pipeline_mode<synchronous>, transform_indices = @transform_2, window_bounds = array<i64: 1, 8>}, {transform_indices = @transform_3, window_bounds = array<i64: 1, 64, 36>}, {pipeline_mode = #tpu.pipeline_mode<synchronous>, transform_indices = @transform_4, window_bounds = array<i64: 36, 8>}, {pipeline_mode = #tpu.pipeline_mode<synchronous>, transform_indices = @transform_5, window_bounds = array<i64: 1, 8>}, {transform_indices = @transform_6, window_bounds = array<i64: 1, 1>}, {transform_indices = @transform_7, window_bounds = array<i64: 1, 64, 8>}]} {
    %c0 = arith.constant 0 : index
    %c0_0 = arith.constant 0 : index
    %c0_1 = arith.constant 0 : index
    %0 = vector.load %arg1[%c0, %c0_0, %c0_1] : memref<1x64x72xbf16, #tpu.memory_space<vmem>>, vector<1x64x72xbf16>
    %1 = vector.shape_cast %0 : vector<1x64x72xbf16> to vector<64x72xbf16>
    %c0_2 = arith.constant 0 : index
    %c0_3 = arith.constant 0 : index
    %2 = vector.load %arg2[%c0_2, %c0_3] : memref<72x8xbf16, #tpu.memory_space<vmem>>, vector<72x8xbf16>
    %cst = arith.constant dense<0.000000e+00> : vector<64x8xf32>
    %3 = tpu.matmul %1, %2, %cst {dimension_numbers = #tpu.dot_dimension_numbers<[1], [0], [0], [1], [0, 0, 1, 1], [], []>} : vector<64x72xbf16>, vector<72x8xbf16>, vector<64x8xf32> -> vector<64x8xf32>
    %c0_4 = arith.constant 0 : index
    %c0_5 = arith.constant 0 : index
    %4 = vector.load %arg3[%c0_4, %c0_5] : memref<1x8xf32, #tpu.memory_space<vmem>>, vector<1x8xf32>
    %5 = vector.broadcast %4 : vector<1x8xf32> to vector<64x8xf32>
    %6 = arith.addf %3, %5 : vector<64x8xf32>
    %cst_6 = arith.constant dense<0.000000e+00> : vector<8xf32>
    %7 = vector.multi_reduction <add>, %6, %cst_6 [0] : vector<64x8xf32> to vector<8xf32>
    %8 = vector.shape_cast %7 : vector<8xf32> to vector<1x8xf32>
    %cst_7 = arith.constant 6.400000e+01 : f32
    %9 = vector.broadcast %cst_7 : f32 to vector<1x8xf32>
    %10 = arith.divf %8, %9 : vector<1x8xf32>
    %11 = vector.broadcast %10 : vector<1x8xf32> to vector<64x8xf32>
    %12 = arith.subf %6, %11 : vector<64x8xf32>
    %13 = arith.mulf %12, %12 : vector<64x8xf32>
    %cst_8 = arith.constant dense<0.000000e+00> : vector<8xf32>
    %14 = vector.multi_reduction <add>, %13, %cst_8 [0] : vector<64x8xf32> to vector<8xf32>
    %15 = vector.shape_cast %14 : vector<8xf32> to vector<1x8xf32>
    %cst_9 = arith.constant 6.400000e+01 : f32
    %16 = vector.broadcast %cst_9 : f32 to vector<1x8xf32>
    %17 = arith.divf %15, %16 : vector<1x8xf32>
    %18 = vector.broadcast %10 : vector<1x8xf32> to vector<64x8xf32>
    %19 = arith.subf %6, %18 : vector<64x8xf32>
    %cst_10 = arith.constant 9.99999974E-6 : f32
    %20 = vector.broadcast %cst_10 : f32 to vector<1x8xf32>
    %21 = arith.addf %17, %20 : vector<1x8xf32>
    %22 = math.rsqrt %21 : vector<1x8xf32>
    %23 = vector.broadcast %22 : vector<1x8xf32> to vector<64x8xf32>
    %24 = arith.mulf %19, %23 : vector<64x8xf32>
    %c0_11 = arith.constant 0 : index
    %c0_12 = arith.constant 0 : index
    %25 = memref.load %arg7[%c0_11, %c0_12] : memref<1x1xf32, #tpu.memory_space<smem>>
    %cst_13 = arith.constant 0.000000e+00 : f32
    %26 = vector.broadcast %cst_13 : f32 to vector<64x8xf32>
    %27 = arith.cmpf ogt, %24, %26 : vector<64x8xf32>
    %28 = vector.broadcast %25 : f32 to vector<64x8xf32>
    %29 = arith.mulf %28, %24 : vector<64x8xf32>
    %30 = arith.select %27, %24, %29 : vector<64x8xi1>, vector<64x8xf32>
    %c0_14 = arith.constant 0 : index
    %c0_15 = arith.constant 0 : index
    %c0_16 = arith.constant 0 : index
    %31 = vector.load %arg4[%c0_14, %c0_15, %c0_16] : memref<1x64x36xbf16, #tpu.memory_space<vmem>>, vector<1x64x36xbf16>
    %32 = vector.shape_cast %31 : vector<1x64x36xbf16> to vector<64x36xbf16>
    %c0_17 = arith.constant 0 : index
    %c0_18 = arith.constant 0 : index
    %33 = vector.load %arg5[%c0_17, %c0_18] : memref<36x8xbf16, #tpu.memory_space<vmem>>, vector<36x8xbf16>
    %cst_19 = arith.constant dense<0.000000e+00> : vector<64x8xf32>
    %34 = tpu.matmul %32, %33, %cst_19 {dimension_numbers = #tpu.dot_dimension_numbers<[1], [0], [0], [1], [0, 0, 1, 1], [], []>} : vector<64x36xbf16>, vector<36x8xbf16>, vector<64x8xf32> -> vector<64x8xf32>
    %c0_20 = arith.constant 0 : index
    %c0_21 = arith.constant 0 : index
    %35 = vector.load %arg6[%c0_20, %c0_21] : memref<1x8xf32, #tpu.memory_space<vmem>>, vector<1x8xf32>
    %36 = vector.broadcast %35 : vector<1x8xf32> to vector<64x8xf32>
    %37 = arith.addf %34, %36 : vector<64x8xf32>
    %38 = arith.addf %30, %37 : vector<64x8xf32>
    %c0_22 = arith.constant 0 : index
    %c0_23 = arith.constant 0 : index
    %c0_24 = arith.constant 0 : index
    %39 = vector.load %arg8[%c0_22, %c0_23, %c0_24] : memref<1x64x8xf32, #tpu.memory_space<vmem>>, vector<1x64x8xf32>
    %40 = vector.shape_cast %39 : vector<1x64x8xf32> to vector<64x8xf32>
    %41 = vector.shape_cast %38 : vector<64x8xf32> to vector<1x64x8xf32>
    tpu.vector_store %arg8[%c0_22, %c0_23, %c0_24], %41 {strides = array<i32>} : memref<1x64x8xf32, #tpu.memory_space<vmem>>, vector<1x64x8xf32>,
    return
  }
  func.func @transform_0(%arg0: i32) -> (i32, i32, i32) {
    %c0_i32 = arith.constant 0 : i32
    %c0_i32_0 = arith.constant 0 : i32
    %c0_i32_1 = arith.constant 0 : i32
    return %arg0, %c0_i32, %c0_i32_0 : i32, i32, i32
  }
  func.func @transform_1(%arg0: i32) -> (i32, i32) {
    %c0_i32 = arith.constant 0 : i32
    %c0_i32_0 = arith.constant 0 : i32
    %c0_i32_1 = arith.constant 0 : i32
    return %c0_i32, %c0_i32_0 : i32, i32
  }
  func.func @transform_2(%arg0: i32) -> (i32, i32) {
    %c0_i32 = arith.constant 0 : i32
    %c0_i32_0 = arith.constant 0 : i32
    %c0_i32_1 = arith.constant 0 : i32
    return %c0_i32, %c0_i32_0 : i32, i32
  }
  func.func @transform_3(%arg0: i32) -> (i32, i32, i32) {
    %c0_i32 = arith.constant 0 : i32
    %c0_i32_0 = arith.constant 0 : i32
    %c0_i32_1 = arith.constant 0 : i32
    return %arg0, %c0_i32, %c0_i32_0 : i32, i32, i32
  }
  func.func @transform_4(%arg0: i32) -> (i32, i32) {
    %c0_i32 = arith.constant 0 : i32
    %c0_i32_0 = arith.constant 0 : i32
    %c0_i32_1 = arith.constant 0 : i32
    return %c0_i32, %c0_i32_0 : i32, i32
  }
  func.func @transform_5(%arg0: i32) -> (i32, i32) {
    %c0_i32 = arith.constant 0 : i32
    %c0_i32_0 = arith.constant 0 : i32
    %c0_i32_1 = arith.constant 0 : i32
    return %c0_i32, %c0_i32_0 : i32, i32
  }
  func.func @transform_6(%arg0: i32) -> (i32, i32) {
    %c0_i32 = arith.constant 0 : i32
    %c0_i32_0 = arith.constant 0 : i32
    %c0_i32_1 = arith.constant 0 : i32
    return %c0_i32, %c0_i32_0 : i32, i32
  }
  func.func @transform_7(%arg0: i32) -> (i32, i32, i32) {
    %c0_i32 = arith.constant 0 : i32
    %c0_i32_0 = arith.constant 0 : i32
    %c0_i32_1 = arith.constant 0 : i32
    return %arg0, %c0_i32, %c0_i32_0 : i32, i32, i32
  }
}

module attributes {stable_mosaic.version = 11 : i64} {
  func.func @_conv_in_prelu_kernel(%arg0: i32, %arg1: memref<1x16x72xbf16, #tpu.memory_space<vmem>>, %arg2: memref<72x16xbf16, #tpu.memory_space<vmem>>, %arg3: memref<1x16xf32, #tpu.memory_space<vmem>>, %arg4: memref<1x1xf32, #tpu.memory_space<smem>>, %arg5: memref<1x16x16xf32, #tpu.memory_space<vmem>>) attributes {dimension_semantics = [#tpu.dimension_semantics<parallel>], iteration_bounds = array<i64: 2>, scalar_prefetch = 0 : i64, scratch_operands = 0 : i64, tpu.core_type = #tpu.core_type<tc>, window_params = [{transform_indices = @transform_0, window_bounds = array<i64: 1, 16, 72>}, {pipeline_mode = #tpu.pipeline_mode<synchronous>, transform_indices = @transform_1, window_bounds = array<i64: 72, 16>}, {pipeline_mode = #tpu.pipeline_mode<synchronous>, transform_indices = @transform_2, window_bounds = array<i64: 1, 16>}, {transform_indices = @transform_3, window_bounds = array<i64: 1, 1>}, {transform_indices = @transform_4, window_bounds = array<i64: 1, 16, 16>}]} {
    %c0 = arith.constant 0 : index
    %c0_0 = arith.constant 0 : index
    %c0_1 = arith.constant 0 : index
    %0 = vector.load %arg1[%c0, %c0_0, %c0_1] : memref<1x16x72xbf16, #tpu.memory_space<vmem>>, vector<1x16x72xbf16>
    %1 = vector.shape_cast %0 : vector<1x16x72xbf16> to vector<16x72xbf16>
    %c0_2 = arith.constant 0 : index
    %c0_3 = arith.constant 0 : index
    %2 = vector.load %arg2[%c0_2, %c0_3] : memref<72x16xbf16, #tpu.memory_space<vmem>>, vector<72x16xbf16>
    %cst = arith.constant dense<0.000000e+00> : vector<16x16xf32>
    %3 = tpu.matmul %1, %2, %cst {dimension_numbers = #tpu.dot_dimension_numbers<[1], [0], [0], [1], [0, 0, 1, 1], [], []>} : vector<16x72xbf16>, vector<72x16xbf16>, vector<16x16xf32> -> vector<16x16xf32>
    %c0_4 = arith.constant 0 : index
    %c0_5 = arith.constant 0 : index
    %4 = vector.load %arg3[%c0_4, %c0_5] : memref<1x16xf32, #tpu.memory_space<vmem>>, vector<1x16xf32>
    %5 = vector.broadcast %4 : vector<1x16xf32> to vector<16x16xf32>
    %6 = arith.addf %3, %5 : vector<16x16xf32>
    %cst_6 = arith.constant dense<0.000000e+00> : vector<16xf32>
    %7 = vector.multi_reduction <add>, %6, %cst_6 [0] : vector<16x16xf32> to vector<16xf32>
    %8 = vector.shape_cast %7 : vector<16xf32> to vector<1x16xf32>
    %cst_7 = arith.constant 1.600000e+01 : f32
    %9 = vector.broadcast %cst_7 : f32 to vector<1x16xf32>
    %10 = arith.divf %8, %9 : vector<1x16xf32>
    %11 = vector.broadcast %10 : vector<1x16xf32> to vector<16x16xf32>
    %12 = arith.subf %6, %11 : vector<16x16xf32>
    %13 = arith.mulf %12, %12 : vector<16x16xf32>
    %cst_8 = arith.constant dense<0.000000e+00> : vector<16xf32>
    %14 = vector.multi_reduction <add>, %13, %cst_8 [0] : vector<16x16xf32> to vector<16xf32>
    %15 = vector.shape_cast %14 : vector<16xf32> to vector<1x16xf32>
    %cst_9 = arith.constant 1.600000e+01 : f32
    %16 = vector.broadcast %cst_9 : f32 to vector<1x16xf32>
    %17 = arith.divf %15, %16 : vector<1x16xf32>
    %18 = vector.broadcast %10 : vector<1x16xf32> to vector<16x16xf32>
    %19 = arith.subf %6, %18 : vector<16x16xf32>
    %cst_10 = arith.constant 9.99999974E-6 : f32
    %20 = vector.broadcast %cst_10 : f32 to vector<1x16xf32>
    %21 = arith.addf %17, %20 : vector<1x16xf32>
    %22 = math.rsqrt %21 : vector<1x16xf32>
    %23 = vector.broadcast %22 : vector<1x16xf32> to vector<16x16xf32>
    %24 = arith.mulf %19, %23 : vector<16x16xf32>
    %c0_11 = arith.constant 0 : index
    %c0_12 = arith.constant 0 : index
    %25 = memref.load %arg4[%c0_11, %c0_12] : memref<1x1xf32, #tpu.memory_space<smem>>
    %cst_13 = arith.constant 0.000000e+00 : f32
    %26 = vector.broadcast %cst_13 : f32 to vector<16x16xf32>
    %27 = arith.cmpf ogt, %24, %26 : vector<16x16xf32>
    %28 = vector.broadcast %25 : f32 to vector<16x16xf32>
    %29 = arith.mulf %28, %24 : vector<16x16xf32>
    %30 = arith.select %27, %24, %29 : vector<16x16xi1>, vector<16x16xf32>
    %c0_14 = arith.constant 0 : index
    %c0_15 = arith.constant 0 : index
    %c0_16 = arith.constant 0 : index
    %31 = vector.load %arg5[%c0_14, %c0_15, %c0_16] : memref<1x16x16xf32, #tpu.memory_space<vmem>>, vector<1x16x16xf32>
    %32 = vector.shape_cast %31 : vector<1x16x16xf32> to vector<16x16xf32>
    %33 = vector.shape_cast %30 : vector<16x16xf32> to vector<1x16x16xf32>
    tpu.vector_store %arg5[%c0_14, %c0_15, %c0_16], %33 {strides = array<i32>} : memref<1x16x16xf32, #tpu.memory_space<vmem>>, vector<1x16x16xf32>,
    return
  }
  func.func @transform_0(%arg0: i32) -> (i32, i32, i32) {
    %c0_i32 = arith.constant 0 : i32
    %c0_i32_0 = arith.constant 0 : i32
    %c0_i32_1 = arith.constant 0 : i32
    return %arg0, %c0_i32, %c0_i32_0 : i32, i32, i32
  }
  func.func @transform_1(%arg0: i32) -> (i32, i32) {
    %c0_i32 = arith.constant 0 : i32
    %c0_i32_0 = arith.constant 0 : i32
    %c0_i32_1 = arith.constant 0 : i32
    return %c0_i32, %c0_i32_0 : i32, i32
  }
  func.func @transform_2(%arg0: i32) -> (i32, i32) {
    %c0_i32 = arith.constant 0 : i32
    %c0_i32_0 = arith.constant 0 : i32
    %c0_i32_1 = arith.constant 0 : i32
    return %c0_i32, %c0_i32_0 : i32, i32
  }
  func.func @transform_3(%arg0: i32) -> (i32, i32) {
    %c0_i32 = arith.constant 0 : i32
    %c0_i32_0 = arith.constant 0 : i32
    %c0_i32_1 = arith.constant 0 : i32
    return %c0_i32, %c0_i32_0 : i32, i32
  }
  func.func @transform_4(%arg0: i32) -> (i32, i32, i32) {
    %c0_i32 = arith.constant 0 : i32
    %c0_i32_0 = arith.constant 0 : i32
    %c0_i32_1 = arith.constant 0 : i32
    return %arg0, %c0_i32, %c0_i32_0 : i32, i32, i32
  }
}

module attributes {stable_mosaic.version = 11 : i64} {
  func.func @_resunit_tail_kernel(%arg0: i32, %arg1: memref<1x16x144xbf16, #tpu.memory_space<vmem>>, %arg2: memref<144x16xbf16, #tpu.memory_space<vmem>>, %arg3: memref<1x16xf32, #tpu.memory_space<vmem>>, %arg4: memref<1x16x72xbf16, #tpu.memory_space<vmem>>, %arg5: memref<72x16xbf16, #tpu.memory_space<vmem>>, %arg6: memref<1x16xf32, #tpu.memory_space<vmem>>, %arg7: memref<1x16x16xf32, #tpu.memory_space<vmem>>) attributes {dimension_semantics = [#tpu.dimension_semantics<parallel>], iteration_bounds = array<i64: 2>, scalar_prefetch = 0 : i64, scratch_operands = 0 : i64, tpu.core_type = #tpu.core_type<tc>, window_params = [{transform_indices = @transform_0, window_bounds = array<i64: 1, 16, 144>}, {pipeline_mode = #tpu.pipeline_mode<synchronous>, transform_indices = @transform_1, window_bounds = array<i64: 144, 16>}, {pipeline_mode = #tpu.pipeline_mode<synchronous>, transform_indices = @transform_2, window_bounds = array<i64: 1, 16>}, {transform_indices = @transform_3, window_bounds = array<i64: 1, 16, 72>}, {pipeline_mode = #tpu.pipeline_mode<synchronous>, transform_indices = @transform_4, window_bounds = array<i64: 72, 16>}, {pipeline_mode = #tpu.pipeline_mode<synchronous>, transform_indices = @transform_5, window_bounds = array<i64: 1, 16>}, {transform_indices = @transform_6, window_bounds = array<i64: 1, 16, 16>}]} {
    %c0 = arith.constant 0 : index
    %c0_0 = arith.constant 0 : index
    %c0_1 = arith.constant 0 : index
    %0 = vector.load %arg1[%c0, %c0_0, %c0_1] : memref<1x16x144xbf16, #tpu.memory_space<vmem>>, vector<1x16x144xbf16>
    %1 = vector.shape_cast %0 : vector<1x16x144xbf16> to vector<16x144xbf16>
    %c0_2 = arith.constant 0 : index
    %c0_3 = arith.constant 0 : index
    %2 = vector.load %arg2[%c0_2, %c0_3] : memref<144x16xbf16, #tpu.memory_space<vmem>>, vector<144x16xbf16>
    %cst = arith.constant dense<0.000000e+00> : vector<16x16xf32>
    %3 = tpu.matmul %1, %2, %cst {dimension_numbers = #tpu.dot_dimension_numbers<[1], [0], [0], [1], [0, 0, 1, 1], [], []>} : vector<16x144xbf16>, vector<144x16xbf16>, vector<16x16xf32> -> vector<16x16xf32>
    %c0_4 = arith.constant 0 : index
    %c0_5 = arith.constant 0 : index
    %4 = vector.load %arg3[%c0_4, %c0_5] : memref<1x16xf32, #tpu.memory_space<vmem>>, vector<1x16xf32>
    %5 = vector.broadcast %4 : vector<1x16xf32> to vector<16x16xf32>
    %6 = arith.addf %3, %5 : vector<16x16xf32>
    %c0_6 = arith.constant 0 : index
    %c0_7 = arith.constant 0 : index
    %c0_8 = arith.constant 0 : index
    %7 = vector.load %arg4[%c0_6, %c0_7, %c0_8] : memref<1x16x72xbf16, #tpu.memory_space<vmem>>, vector<1x16x72xbf16>
    %8 = vector.shape_cast %7 : vector<1x16x72xbf16> to vector<16x72xbf16>
    %c0_9 = arith.constant 0 : index
    %c0_10 = arith.constant 0 : index
    %9 = vector.load %arg5[%c0_9, %c0_10] : memref<72x16xbf16, #tpu.memory_space<vmem>>, vector<72x16xbf16>
    %cst_11 = arith.constant dense<0.000000e+00> : vector<16x16xf32>
    %10 = tpu.matmul %8, %9, %cst_11 {dimension_numbers = #tpu.dot_dimension_numbers<[1], [0], [0], [1], [0, 0, 1, 1], [], []>} : vector<16x72xbf16>, vector<72x16xbf16>, vector<16x16xf32> -> vector<16x16xf32>
    %c0_12 = arith.constant 0 : index
    %c0_13 = arith.constant 0 : index
    %11 = vector.load %arg6[%c0_12, %c0_13] : memref<1x16xf32, #tpu.memory_space<vmem>>, vector<1x16xf32>
    %12 = vector.broadcast %11 : vector<1x16xf32> to vector<16x16xf32>
    %13 = arith.addf %10, %12 : vector<16x16xf32>
    %14 = arith.addf %6, %13 : vector<16x16xf32>
    %c0_14 = arith.constant 0 : index
    %c0_15 = arith.constant 0 : index
    %c0_16 = arith.constant 0 : index
    %15 = vector.load %arg7[%c0_14, %c0_15, %c0_16] : memref<1x16x16xf32, #tpu.memory_space<vmem>>, vector<1x16x16xf32>
    %16 = vector.shape_cast %15 : vector<1x16x16xf32> to vector<16x16xf32>
    %17 = vector.shape_cast %14 : vector<16x16xf32> to vector<1x16x16xf32>
    tpu.vector_store %arg7[%c0_14, %c0_15, %c0_16], %17 {strides = array<i32>} : memref<1x16x16xf32, #tpu.memory_space<vmem>>, vector<1x16x16xf32>,
    return
  }
  func.func @transform_0(%arg0: i32) -> (i32, i32, i32) {
    %c0_i32 = arith.constant 0 : i32
    %c0_i32_0 = arith.constant 0 : i32
    %c0_i32_1 = arith.constant 0 : i32
    return %arg0, %c0_i32, %c0_i32_0 : i32, i32, i32
  }
  func.func @transform_1(%arg0: i32) -> (i32, i32) {
    %c0_i32 = arith.constant 0 : i32
    %c0_i32_0 = arith.constant 0 : i32
    %c0_i32_1 = arith.constant 0 : i32
    return %c0_i32, %c0_i32_0 : i32, i32
  }
  func.func @transform_2(%arg0: i32) -> (i32, i32) {
    %c0_i32 = arith.constant 0 : i32
    %c0_i32_0 = arith.constant 0 : i32
    %c0_i32_1 = arith.constant 0 : i32
    return %c0_i32, %c0_i32_0 : i32, i32
  }
  func.func @transform_3(%arg0: i32) -> (i32, i32, i32) {
    %c0_i32 = arith.constant 0 : i32
    %c0_i32_0 = arith.constant 0 : i32
    %c0_i32_1 = arith.constant 0 : i32
    return %arg0, %c0_i32, %c0_i32_0 : i32, i32, i32
  }
  func.func @transform_4(%arg0: i32) -> (i32, i32) {
    %c0_i32 = arith.constant 0 : i32
    %c0_i32_0 = arith.constant 0 : i32
    %c0_i32_1 = arith.constant 0 : i32
    return %c0_i32, %c0_i32_0 : i32, i32
  }
  func.func @transform_5(%arg0: i32) -> (i32, i32) {
    %c0_i32 = arith.constant 0 : i32
    %c0_i32_0 = arith.constant 0 : i32
    %c0_i32_1 = arith.constant 0 : i32
    return %c0_i32, %c0_i32_0 : i32, i32
  }
  func.func @transform_6(%arg0: i32) -> (i32, i32, i32) {
    %c0_i32 = arith.constant 0 : i32
    %c0_i32_0 = arith.constant 0 : i32
    %c0_i32_1 = arith.constant 0 : i32
    return %arg0, %c0_i32, %c0_i32_0 : i32, i32, i32
  }
}

module attributes {stable_mosaic.version = 11 : i64} {
  func.func @_linear_sigmoid_kernel(%arg0: memref<2x256xbf16, #tpu.memory_space<vmem>>, %arg1: memref<256x128xbf16, #tpu.memory_space<vmem>>, %arg2: memref<1x128xf32, #tpu.memory_space<vmem>>, %arg3: memref<2x128xf32, #tpu.memory_space<vmem>>) attributes {dimension_semantics = [], scalar_prefetch = 0 : i64, scratch_operands = 0 : i64, tpu.core_type = #tpu.core_type<tc>} {
    %c0 = arith.constant 0 : index
    %c0_0 = arith.constant 0 : index
    %0 = vector.load %arg0[%c0, %c0_0] : memref<2x256xbf16, #tpu.memory_space<vmem>>, vector<2x256xbf16>
    %c0_1 = arith.constant 0 : index
    %c0_2 = arith.constant 0 : index
    %1 = vector.load %arg1[%c0_1, %c0_2] : memref<256x128xbf16, #tpu.memory_space<vmem>>, vector<256x128xbf16>
    %cst = arith.constant dense<0.000000e+00> : vector<2x128xf32>
    %2 = tpu.matmul %0, %1, %cst {dimension_numbers = #tpu.dot_dimension_numbers<[1], [0], [0], [1], [0, 0, 1, 1], [], []>} : vector<2x256xbf16>, vector<256x128xbf16>, vector<2x128xf32> -> vector<2x128xf32>
    %c0_3 = arith.constant 0 : index
    %c0_4 = arith.constant 0 : index
    %3 = vector.load %arg2[%c0_3, %c0_4] : memref<1x128xf32, #tpu.memory_space<vmem>>, vector<1x128xf32>
    %4 = vector.broadcast %3 : vector<1x128xf32> to vector<2x128xf32>
    %5 = arith.addf %2, %4 : vector<2x128xf32>
    %cst_5 = arith.constant 0.000000e+00 : f32
    %6 = vector.broadcast %cst_5 : f32 to vector<2x128xf32>
    %7 = arith.subf %6, %5 : vector<2x128xf32>
    %8 = math.exp %7 : vector<2x128xf32>
    %cst_6 = arith.constant 1.000000e+00 : f32
    %9 = vector.broadcast %cst_6 : f32 to vector<2x128xf32>
    %10 = arith.addf %9, %8 : vector<2x128xf32>
    %cst_7 = arith.constant 1.000000e+00 : f32
    %11 = vector.broadcast %cst_7 : f32 to vector<2x128xf32>
    %12 = arith.divf %11, %10 : vector<2x128xf32>
    %c0_8 = arith.constant 0 : index
    %c0_9 = arith.constant 0 : index
    %13 = vector.load %arg3[%c0_8, %c0_9] : memref<2x128xf32, #tpu.memory_space<vmem>>, vector<2x128xf32>
    tpu.vector_store %arg3[%c0_8, %c0_9], %12 {strides = array<i32>} : memref<2x128xf32, #tpu.memory_space<vmem>>, vector<2x128xf32>,
    return
  }
}

</mosaic_0001>

<bundles_post_ra>
// kernel: _lambda_.5
= control target key start
LH: loop header
LB: loop body
LE: loop exit
PB: predicated region body
PF: predicated region fallthrough
CT: control target
= control target key end

     0   :  { %s605_s17 = smov 0   ;;  %s670_s0 = inlined_call_operand.vmem [shape: bf16[2,64,36], index: 0, kind: input, shape index: {}]   ;;  %s671_s1 = inlined_call_operand.vmem [shape: bf16[36,8], index: 1, kind: input, shape index: {}]   ;;  %s672_s2 = inlined_call_operand.vmem [shape: f32[1,8], index: 2, kind: input, shape index: {}]   ;;  %s673_s3 = inlined_call_operand.<no memory space> [shape: f32[1,1], index: 3, kind: input, shape index: {}]   ;;  %s674_s4 = inlined_call_operand.vmem [shape: f32[2,64,8], index: 4, kind: output, shape index: {}]  }
   0x1   :  { %9 = sst [smem:[#allocation2]] %s673_s3 }
   0x2 LB: > { %s498_s18 = sadd.s32 4294967295, %s575_s17   ;;  %p502_p0 = scmp.ge.s32.totalorder %s575_s17, 1  ;;  %s575_s17 = sphi %s605_s17, %s15_s17  }
   0x3   : > { %p163_p1 = scmp.lt.s32.totalorder %s575_s17, 3 }
   0x5   : > { %p164_p2 = pnand %p502_p0, %p163_p1 }
   0x6   : > { %v560_v0 = vld [vmem:[%s671_s1] sm:$0xff] (!%p164_p2)   ;;  %v561_v1 = vld [vmem:[%s671_s1 + $0x8] sm:$0xff] (!%p164_p2)   ;;  %p189_p3 = scmp.lt.s32.totalorder (!%p164_p2), %s498_s18, 1  ;;  %v562_v2 = vld [vmem:[%s671_s1 + $0x10] ss:$0 sps:$4 sm:$0x33] (!%p164_p2)  }
   0x7   : > { %167 = sbr.rel (%p164_p2) target bundleno = 323 (0x143), region = 36  ;;  %530 = vmatprep.subr.bf16.mxu0 (!%p164_p2), %v560_v0  ;;  %544 = vmatprep.subr.bf16.mxu1 (!%p164_p2), %v560_v0  ;;  %vm268_vm0 = vcmask (!%p164_p2), 1041408   ;;  %vm255_vm1 = vcmask (!%p164_p2), 293888   ;;  %v507_v8 = vld [vmem:[%s672_s2] ss:$0 sm:$0xff] (!%p164_p2)  ;;  %vm337_vm2 = vcmask (!%p164_p2), 64512  }
   0x8   : > { %531 = vmatpush3.bf16.msra.mxu0 (!%p164_p2), %v560_v0  ;;  %547 = vmatpush3.bf16.msra.mxu1 (!%p164_p2), %v560_v0  ;;  %v270_v4 = vsel (!%p164_p2), %vm268_vm0, %v562_v2, 0  ;;  %s409_s30 = sld [smem:[#allocation2]] (!%p164_p2) }
   0x9   : > { %532 = vmatprep.subr.bf16.mxu0 (!%p164_p2), %v561_v1  ;;  %545 = vmatprep.subr.bf16.mxu1 (!%p164_p2), %v561_v1 }
   0xc   : > { %533 = vmatpush3.bf16.msra.mxu0 (!%p164_p2), %v561_v1  ;;  %548 = vmatpush3.bf16.msra.mxu1 (!%p164_p2), %v561_v1 }
   0xd   : > { %550 = vmatprep.subr.msk.bf16.mxu0 (!%p164_p2), %vm268_vm0, %v562_v2  ;;  %551 = vmatprep.subr.msk.bf16.mxu1 (!%p164_p2), %vm268_vm0, %v562_v2 }
   0xe   : > { %s676_s18 = smov (!%p189_p3, %s498_s18), 1 }
   0xf   : > { %s521_s24 = sshll.u32 %s676_s18, 5  ;;  %s522_s5 = sshll.u32 %s676_s18, 6 }
  0x10   : > { %s193_s27 = scalar_lea.vmem %s670_s0, %s521_s24  ;;  %535 = vmatpush3.bf16.msra.mxu0 %v270_v4  ;;  %549 = vmatpush3.bf16.msra.mxu1 %v270_v4  ;;  %s198_s8 = scalar_lea.vmem %s674_s4, %s522_s5 }
  0x11   : > { %v563_v3 = vld [vmem:[%s193_s27] sm:$0xff]   ;;  %v564_v5 = vld [vmem:[%s193_s27 + $0x8] sm:$0xff]   ;;  %v565_v6 = vld [vmem:[%s193_s27 + $0x10] sm:$0xff]  }
  0x12   : > { %536 = vmatprep.mubr.msk.bf16.mxu0 %vm255_vm1, %v563_v3  ;;  %v566_v7 = vld [vmem:[%s193_s27 + $0x18] sm:$0xff]   ;;  %540 = vmatprep.mubr.msk.bf16.mxu1 %vm255_vm1, %v565_v6 }
  0x13   : > { %537 = vmatmul.mubr.msk.bf16.vlgmr.msra.gmra.mrb[0].mxu0 %vm255_vm1, %v564_v5  ;;  %541 = vmatmul.mubr.msk.bf16.vlgmr.msra.gmra.mrb[0].mxu1 %vm255_vm1, %v566_v7 }
  0xe6   : > { %v538_v9 = vpop.f32.mrb[0].mxu0  ;;  %v542_v10 = vpop.f32.mrb[0].mxu1 }
  0xe7   : > { %v306_v11 = vpop.f32.mrb[1].mxu0  ;;  %v322_v12 = vpop.f32.mrb[1].mxu1  ;;  %v315_v18 = vadd.f32 %v538_v9, %v507_v8  ;;  %v331_v31 = vadd.f32 %v542_v10, %v507_v8 }
  0xe8   : > { %v307_v13 = vadd.f32 %v507_v8, %v306_v11  ;;  %v539_v14 = vpop.f32.mrb[2].mxu0  ;;  %v543_v15 = vpop.f32.mrb[2].mxu1  ;;  %v323_v23 = vadd.f32 %v507_v8, %v322_v12 }
  0xe9   : > { %v309_v16 = vpop.f32.mrb[3].mxu0  ;;  %v325_v17 = vpop.f32.mrb[3].mxu1  ;;  %v318_v21 = vadd.f32 %v539_v14, %v507_v8  ;;  %v341_v25 = vsel %vm337_vm2, %v315_v18, 0.0  ;;  %v334_v33 = vadd.f32 %v543_v15, %v507_v8  ;;  %v349_v36 = vsel %vm337_vm2, %v331_v31, 0.0 }
  0xea   : > { %v310_v19 = vadd.f32 %v507_v8, %v309_v16  ;;  %v338_v20 = vsel %vm337_vm2, %v307_v13, 0.0  ;;  %v345_v28 = vsel %vm337_vm2, %v323_v23, 0.0  ;;  %v326_v29 = vadd.f32 %v507_v8, %v325_v17 }
  0xeb   : > { %v343_v27 = vsel %vm337_vm2, %v318_v21, 0.0  ;;  %v351_v38 = vsel %vm337_vm2, %v334_v33, 0.0 }
  0xec   : > { %v339_v22 = vsel %vm337_vm2, %v310_v19, 0.0  ;;  %v347_v34 = vsel %vm337_vm2, %v326_v29, 0.0 }
  0xed   : > { %v340_v24 = vadd.f32 %v339_v22, %v338_v20 }
  0xef   : > { %v342_v26 = vadd.f32 %v341_v25, %v340_v24 }
  0xf1   : > { %v344_v30 = vadd.f32 %v343_v27, %v342_v26 }
  0xf3   : > { %v346_v32 = vadd.f32 %v345_v28, %v344_v30 }
  0xf5   : > { %v348_v35 = vadd.f32 %v347_v34, %v346_v32 }
  0xf7   : > { %v350_v37 = vadd.f32 %v349_v36, %v348_v35 }
  0xf9   : > { %v352_v39 = vadd.f32 %v351_v38, %v350_v37 }
  0xfb   : > { %v353_v40 = vrot.slane %v352_v39, 4 }
  0xfd   : > { %v354_v41 = vadd.f32 %v353_v40, %v352_v39 }
  0xff   : > { %v355_v42 = vrot.slane %v354_v41, 2 }
 0x101   : > { %v356_v43 = vadd.f32 %v355_v42, %v354_v41 }
 0x103   : > { %v357_v44 = vrot.slane %v356_v43, 1 }
 0x105   : > { %v358_v45 = vadd.f32 %v357_v44, %v356_v43 }
 0x107   : > { %v360_v46 = vmul.f32 0.015625, %v358_v45 }
 0x109   : > { %v361_v47 = vsub.f32 %v307_v13, %v360_v46  ;;  %v362_v48 = vsub.f32 %v310_v19, %v360_v46  ;;  %v363_v49 = vsub.f32 %v315_v18, %v360_v46  ;;  %v364_v50 = vsub.f32 %v318_v21, %v360_v46 }
 0x10a   : > { %v365_v51 = vsub.f32 %v323_v23, %v360_v46  ;;  %v366_v52 = vsub.f32 %v326_v29, %v360_v46  ;;  %v367_v53 = vsub.f32 %v331_v31, %v360_v46  ;;  %v368_v54 = vsub.f32 %v334_v33, %v360_v46 }
 0x10b   : > { %v369_v55 = vmul.f32 %v361_v47, %v361_v47  ;;  %v370_v56 = vmul.f32 %v362_v48, %v362_v48  ;;  %v371_v57 = vmul.f32 %v363_v49, %v363_v49  ;;  %v372_v58 = vmul.f32 %v364_v50, %v364_v50 }
 0x10c   : > { %v373_v62 = vmul.f32 %v365_v51, %v365_v51  ;;  %v374_v1 = vmul.f32 %v366_v52, %v366_v52  ;;  %v375_v4 = vmul.f32 %v367_v53, %v367_v53  ;;  %v376_v7 = vmul.f32 %v368_v54, %v368_v54 }
 0x10d   : > { %v377_v59 = vsel %vm337_vm2, %v369_v55, 0.0  ;;  %v378_v60 = vsel %vm337_vm2, %v370_v56, 0.0  ;;  %v380_v63 = vsel %vm337_vm2, %v371_v57, 0.0  ;;  %v382_v2 = vsel %vm337_vm2, %v372_v58, 0.0 }
 0x10e   : > { %v379_v61 = vadd.f32 %v378_v60, %v377_v59  ;;  %v384_v5 = vsel %vm337_vm2, %v373_v62, 0.0  ;;  %v386_v8 = vsel %vm337_vm2, %v374_v1, 0.0  ;;  %v388_v10 = vsel %vm337_vm2, %v375_v4, 0.0 }
 0x10f   : > { %v390_v12 = vsel %vm337_vm2, %v376_v7, 0.0  ;;  %v418_v23 = vstv %s409_s30 }
 0x110   : > { %v381_v0 = vadd.f32 %v380_v63, %v379_v61 }
 0x112   : > { %v383_v3 = vadd.f32 %v382_v2, %v381_v0 }
 0x114   : > { %v385_v6 = vadd.f32 %v384_v5, %v383_v3 }
 0x116   : > { %v387_v9 = vadd.f32 %v386_v8, %v385_v6 }
 0x118   : > { %v389_v11 = vadd.f32 %v388_v10, %v387_v9 }
 0x11a   : > { %v391_v13 = vadd.f32 %v390_v12, %v389_v11 }
 0x11c   : > { %v392_v14 = vrot.slane %v391_v13, 4 }
 0x11e   : > { %v393_v15 = vadd.f32 %v392_v14, %v391_v13 }
 0x120   : > { %v394_v16 = vrot.slane %v393_v15, 2 }
 0x122   : > { %v395_v17 = vadd.f32 %v394_v16, %v393_v15 }
 0x124   : > { %v396_v18 = vrot.slane %v395_v17, 1 }
 0x126   : > { %v397_v19 = vadd.f32 %v396_v18, %v395_v17 }
 0x128   : > { %v398_v20 = vmul.f32 0.015625, %v397_v19 }
 0x12a   : > { %v399_v21 = vadd.f32 1e-05, %v398_v20 }
 0x12c   : > { %567 = vrsqrt.f32 %v399_v21 }
 0x136   : > { %v568_v22 = vpop.eup %567 }
 0x137   : > { %v401_v24 = vmul.f32 %v568_v22, %v361_v47  ;;  %v402_v25 = vmul.f32 %v568_v22, %v362_v48  ;;  %v403_v26 = vmul.f32 %v568_v22, %v363_v49  ;;  %v404_v27 = vmul.f32 %v568_v22, %v364_v50 }
 0x138   : > { %v405_v28 = vmul.f32 %v568_v22, %v365_v51  ;;  %v406_v29 = vmul.f32 %v568_v22, %v366_v52  ;;  %v407_v30 = vmul.f32 %v568_v22, %v367_v53  ;;  %v408_v31 = vmul.f32 %v568_v22, %v368_v54 }
 0x139   : > { %vm410_vm3 = vcmp.gt.f32.partialorder %v401_v24, 0.0  ;;  %vm411_vm4 = vcmp.gt.f32.partialorder %v402_v25, 0.0  ;;  %vm412_vm5 = vcmp.gt.f32.partialorder %v403_v26, 0.0  ;;  %vm413_vm6 = vcmp.gt.f32.partialorder %v404_v27, 0.0 }
 0x13a   : > { %vm414_vm7 = vcmp.gt.f32.partialorder %v405_v28, 0.0  ;;  %vm415_vm8 = vcmp.gt.f32.partialorder %v406_v29, 0.0  ;;  %vm416_vm9 = vcmp.gt.f32.partialorder %v407_v30, 0.0  ;;  %vm417_vm10 = vcmp.gt.f32.partialorder %v408_v31, 0.0 }
 0x13b   : > { %v419_v32 = vmul.f32 %v418_v23, %v401_v24  ;;  %v420_v33 = vmul.f32 %v418_v23, %v402_v25  ;;  %v421_v34 = vmul.f32 %v418_v23, %v403_v26  ;;  %v422_v35 = vmul.f32 %v418_v23, %v404_v27 }
 0x13c   : > { %v423_v36 = vmul.f32 %v418_v23, %v405_v28  ;;  %v424_v37 = vmul.f32 %v418_v23, %v406_v29  ;;  %v425_v38 = vmul.f32 %v418_v23, %v407_v30  ;;  %v426_v39 = vmul.f32 %v418_v23, %v408_v31 }
 0x13d   : > { %v427_v40 = vsel %vm410_vm3, %v401_v24, %v419_v32  ;;  %v428_v41 = vsel %vm411_vm4, %v402_v25, %v420_v33  ;;  %v429_v42 = vsel %vm412_vm5, %v403_v26, %v421_v34  ;;  %v430_v43 = vsel %vm413_vm6, %v404_v27, %v422_v35 }
 0x13e   : > { %v431_v44 = vsel %vm414_vm7, %v405_v28, %v423_v36  ;;  %v432_v45 = vsel %vm415_vm8, %v406_v29, %v424_v37  ;;  %v433_v46 = vsel %vm416_vm9, %v407_v30, %v425_v38  ;;  %v434_v47 = vsel %vm417_vm10, %v408_v31, %v426_v39  ;;  %435 = vst.msk [vmem:[%s198_s8] sm:$0xff] %vm337_vm2, %v427_v40 }
 0x13f   : > { %436 = vst.msk [vmem:[%s198_s8 + $0x8] sm:$0xff] %vm337_vm2, %v428_v41  ;;  %437 = vst.msk [vmem:[%s198_s8 + $0x10] sm:$0xff] %vm337_vm2, %v429_v42 }
 0x140   : > { %438 = vst.msk [vmem:[%s198_s8 + $0x18] sm:$0xff] %vm337_vm2, %v430_v43  ;;  %439 = vst.msk [vmem:[%s198_s8 + $0x20] sm:$0xff] %vm337_vm2, %v431_v44 }
 0x141   : > { %440 = vst.msk [vmem:[%s198_s8 + $0x28] sm:$0xff] %vm337_vm2, %v432_v45  ;;  %441 = vst.msk [vmem:[%s198_s8 + $0x30] sm:$0xff] %vm337_vm2, %v433_v46 }
 0x142   : > { %442 = vst.msk [vmem:[%s198_s8 + $0x38] sm:$0xff] %vm337_vm2, %v434_v47 }
 0x143 PF: > { %s15_s17 = sadd.s32 1, %s575_s17  }
 0x144   : > { %p12_p4 = scmp.ge.s32.totalorder %s15_s17, 4  }
 0x146   :  { %14 = sbr.rel (!%p12_p4) target bundleno = 2 (0x2), region = 66 }

// kernel: _lambda_.6
= control target key start
LH: loop header
LB: loop body
LE: loop exit
PB: predicated region body
PF: predicated region fallthrough
CT: control target
= control target key end

     0   :  { %s941_s26 = smov 0   ;;  %s1067_s0 = inlined_call_operand.vmem [shape: bf16[2,64,72], index: 0, kind: input, shape index: {}]   ;;  %s1068_s1 = inlined_call_operand.vmem [shape: bf16[72,8], index: 1, kind: input, shape index: {}]   ;;  %s1069_s2 = inlined_call_operand.vmem [shape: f32[1,8], index: 2, kind: input, shape index: {}]   ;;  %s1070_s3 = inlined_call_operand.vmem [shape: bf16[2,64,36], index: 3, kind: input, shape index: {}]   ;;  %s1071_s4 = inlined_call_operand.vmem [shape: bf16[36,8], index: 4, kind: input, shape index: {}]   ;;  %s1072_s5 = inlined_call_operand.vmem [shape: f32[1,8], index: 5, kind: input, shape index: {}]   ;;  %s1073_s6 = inlined_call_operand.<no memory space> [shape: f32[1,1], index: 6, kind: input, shape index: {}]   ;;  %s1074_s7 = inlined_call_operand.vmem [shape: f32[2,64,8], index: 7, kind: output, shape index: {}]  }
   0x1   :  { %12 = sst [smem:[#allocation2]] %s1073_s6 }
   0x2 LB: > { %s772_s27 = sadd.s32 4294967295, %s896_s26   ;;  %p776_p0 = scmp.ge.s32.totalorder %s896_s26, 1  ;;  %s896_s26 = sphi %s941_s26, %s18_s26  }
   0x3   : > { %p248_p1 = scmp.lt.s32.totalorder %s896_s26, 3 }
   0x5   : > { %p249_p2 = pnand %p776_p0, %p248_p1 }
   0x6   : > { %v872_v0 = vld [vmem:[%s1068_s1] sm:$0xff] (!%p249_p2)   ;;  %v873_v1 = vld [vmem:[%s1068_s1 + $0x8] sm:$0xff] (!%p249_p2)   ;;  %p285_p3 = scmp.lt.s32.totalorder (!%p249_p2), %s772_s27, 1  ;;  %v874_v2 = vld [vmem:[%s1068_s1 + $0x10] sm:$0xff] (!%p249_p2)   ;;  %vm372_vm0 = vcmask (!%p249_p2), 588800   ;;  %vm620_vm1 = vcmask (!%p249_p2), 1041408  }
   0x7   : > { %252 = sbr.rel (%p249_p2) target bundleno = 333 (0x14d), region = 48  ;;  %830 = vmatprep.subr.bf16.mxu0 (!%p249_p2), %v872_v0  ;;  %v881_v3 = vld [vmem:[%s1071_s4] sm:$0xff] (!%p249_p2)   ;;  %v882_v4 = vld [vmem:[%s1071_s4 + $0x8] sm:$0xff] (!%p249_p2)   ;;  %v875_v6 = vld [vmem:[%s1068_s1 + $0x18] sm:$0xff] (!%p249_p2)   ;;  %vm607_vm2 = vcmask (!%p249_p2), 293888   ;;  %vm385_vm3 = vcmask (!%p249_p2), 1043456  }
   0x8   : > { %831 = vmatpush3.bf16.msra.mxu0 (!%p249_p2), %v872_v0  ;;  %848 = vmatprep.subr.bf16.mxu1 (!%p249_p2), %v881_v3  ;;  %v876_v7 = vld [vmem:[%s1068_s1 + $0x20] ss:$0 sps:$4 sm:$0xff] (!%p249_p2)   ;;  %v883_v8 = vld [vmem:[%s1071_s4 + $0x10] ss:$0 sps:$4 sm:$0x33] (!%p249_p2)   ;;  %vm454_vm4 = vcmask (!%p249_p2), 64512  }
   0x9   : > { %832 = vmatprep.subr.bf16.mxu0 (!%p249_p2), %v873_v1  ;;  %849 = vmatpush3.bf16.msra.mxu1 (!%p249_p2), %v881_v3  ;;  %v622_v10 = vsel (!%p249_p2), %vm620_vm1, %v883_v8, 0  ;;  %v387_v12 = vsel (!%p249_p2), %vm385_vm3, %v876_v7, 0  ;;  %v783_v20 = vld [vmem:[%s1069_s2] ss:$0 sm:$0xff] (!%p249_p2)  ;;  %s526_s30 = sld [smem:[#allocation2]] (!%p249_p2) }
   0xa   : > { %850 = vmatprep.subr.bf16.mxu1 (!%p249_p2), %v882_v4 }
   0xc   : > { %833 = vmatpush3.bf16.msra.mxu0 (!%p249_p2), %v873_v1 }
   0xd   : > { %834 = vmatprep.subr.bf16.mxu0 (!%p249_p2), %v874_v2  ;;  %851 = vmatpush3.bf16.msra.mxu1 (!%p249_p2), %v882_v4 }
   0xe   : > { %s1076_s27 = smov (!%p285_p3, %s772_s27), 1  ;;  %863 = vmatprep.subr.msk.bf16.mxu1 %vm620_vm1, %v883_v8 }
   0xf   : > { %s811_s10 = sshll.u32 %s1076_s27, 5 }
  0x10   : > { %s967_s15 = scalar_lea.vmem %s1067_s0, %s811_s10  ;;  %s294_s22 = scalar_lea.vmem %s1070_s3, %s811_s10  ;;  %835 = vmatpush3.bf16.msra.mxu0 %v874_v2 }
  0x11   : > { %v877_v5 = vld [vmem:[%s967_s15] sm:$0xff]   ;;  %836 = vmatprep.subr.bf16.mxu0 %v875_v6  ;;  %v885_v11 = vld [vmem:[%s294_s22 + $0x8] sm:$0xff]   ;;  %853 = vmatpush3.bf16.msra.mxu1 %v622_v10  ;;  %v886_v13 = vld [vmem:[%s294_s22 + $0x10] sm:$0xff]   ;;  %s813_s10 = sshll.u32 %s1076_s27, 6 }
  0x12   : > { %840 = vmatprep.mubr.msk.bf16.mxu0 %vm372_vm0, %v877_v5  ;;  %v884_v9 = vld [vmem:[%s294_s22] sm:$0xff]   ;;  %v878_v14 = vld [vmem:[%s967_s15 + $0x8] sm:$0xff]   ;;  %v879_v15 = vld [vmem:[%s967_s15 + $0x10] sm:$0xff]   ;;  %s1043_s13 = scalar_lea.vmem %s1074_s7, %s813_s10 }
  0x13   : > { %854 = vmatprep.mubr.msk.bf16.mxu1 %vm607_vm2, %v884_v9  ;;  %v887_v16 = vld [vmem:[%s294_s22 + $0x18] sm:$0xff]  }
  0x14   : > { %837 = vmatpush3.bf16.msra.mxu0 %v875_v6  ;;  %855 = vmatmul.mubr.msk.bf16.vlgmr.msra.gmra.mrb[0].mxu1 %vm607_vm2, %v885_v11  ;;  %v880_v17 = vld [vmem:[%s967_s15 + $0x18] sm:$0xff]  }
  0x15   : > { %862 = vmatprep.subr.msk.bf16.mxu0 %vm385_vm3, %v876_v7  ;;  %858 = vmatprep.mubr.msk.bf16.mxu1 %vm607_vm2, %v886_v13 }
  0x18   : > { %839 = vmatpush3.bf16.msra.mxu0 %v387_v12 }
  0x1b   : > { %841 = vmatmul.mubr.msk.bf16.vlgmr.msra.gmra.mrb[0].mxu0 %vm372_vm0, %v878_v14 }
  0x1c   : > { %844 = vmatprep.mubr.msk.bf16.mxu0 %vm372_vm0, %v879_v15  ;;  %859 = vmatmul.mubr.msk.bf16.gmra.mrb[4].mxu1 %vm607_vm2, %v887_v16 }
  0x23   : > { %845 = vmatmul.mubr.msk.bf16.gmra.mrb[4].mxu0 %vm372_vm0, %v880_v17 }
  0xe7   : > { %v996_v18 = vpop.f32.mrb[0].mxu1 }
  0xe8   : > { %v998_v19 = vpop.f32.mrb[1].mxu1 }
  0xe9   : > { %v1003_v21 = vpop.f32.mrb[2].mxu1 }
  0xea   : > { %v1005_v23 = vpop.f32.mrb[3].mxu1 }
  0xee   : > { %v842_v22 = vpop.f32.mrb[0].mxu0 }
  0xef   : > { %v423_v24 = vpop.f32.mrb[1].mxu0  ;;  %v432_v28 = vadd.f32 %v842_v22, %v783_v20  ;;  %v1007_v30 = vpop.f32.mrb[4].mxu1 }
  0xf0   : > { %v424_v25 = vadd.f32 %v783_v20, %v423_v24  ;;  %v843_v26 = vpop.f32.mrb[2].mxu0  ;;  %v1011_v34 = vpop.f32.mrb[5].mxu1 }
  0xf1   : > { %v426_v27 = vpop.f32.mrb[3].mxu0  ;;  %v435_v32 = vadd.f32 %v843_v26, %v783_v20  ;;  %v1013_v36 = vpop.f32.mrb[6].mxu1  ;;  %v458_v37 = vsel %vm454_vm4, %v432_v28, 0.0 }
  0xf2   : > { %v427_v29 = vadd.f32 %v783_v20, %v426_v27  ;;  %v455_v31 = vsel %vm454_vm4, %v424_v25, 0.0  ;;  %v1016_v39 = vpop.f32.mrb[7].mxu1 }
  0xf3   : > { %v460_v42 = vsel %vm454_vm4, %v435_v32, 0.0 }
  0xf4   : > { %v456_v33 = vsel %vm454_vm4, %v427_v29, 0.0 }
  0xf5   : > { %v457_v35 = vadd.f32 %v456_v33, %v455_v31 }
  0xf6   : > { %v846_v38 = vpop.f32.mrb[4].mxu0 }
  0xf7   : > { %v459_v40 = vadd.f32 %v458_v37, %v457_v35  ;;  %v439_v41 = vpop.f32.mrb[5].mxu0  ;;  %v448_v47 = vadd.f32 %v846_v38, %v783_v20 }
  0xf8   : > { %v440_v43 = vadd.f32 %v783_v20, %v439_v41  ;;  %v847_v44 = vpop.f32.mrb[6].mxu0 }
  0xf9   : > { %v461_v45 = vadd.f32 %v460_v42, %v459_v40  ;;  %v442_v46 = vpop.f32.mrb[7].mxu0  ;;  %v451_v51 = vadd.f32 %v847_v44, %v783_v20  ;;  %v466_v54 = vsel %vm454_vm4, %v448_v47, 0.0 }
  0xfa   : > { %v462_v48 = vsel %vm454_vm4, %v440_v43, 0.0  ;;  %v443_v49 = vadd.f32 %v783_v20, %v442_v46 }
  0xfb   : > { %v463_v50 = vadd.f32 %v462_v48, %v461_v45  ;;  %v468_v56 = vsel %vm454_vm4, %v451_v51, 0.0  ;;  %v797_v48 = vld [vmem:[%s1072_s5] ss:$0 sm:$0xff] }
  0xfc   : > { %v464_v52 = vsel %vm454_vm4, %v443_v49, 0.0 }
  0xfd   : > { %v465_v53 = vadd.f32 %v464_v52, %v463_v50  ;;  %v667_v50 = vadd.f32 %v996_v18, %v797_v48  ;;  %v659_v52 = vadd.f32 %v797_v48, %v998_v19 }
  0xff   : > { %v467_v55 = vadd.f32 %v466_v54, %v465_v53  ;;  %v670_v53 = vadd.f32 %v1003_v21, %v797_v48  ;;  %v662_v54 = vadd.f32 %v797_v48, %v1005_v23 }
 0x101   : > { %v469_v57 = vadd.f32 %v468_v56, %v467_v55  ;;  %v683_v55 = vadd.f32 %v1007_v30, %v797_v48 }
 0x103   : > { %v470_v58 = vrot.slane %v469_v57, 4 }
 0x105   : > { %v471_v59 = vadd.f32 %v470_v58, %v469_v57 }
 0x107   : > { %v472_v60 = vrot.slane %v471_v59, 2 }
 0x109   : > { %v473_v61 = vadd.f32 %v472_v60, %v471_v59 }
 0x10b   : > { %v474_v62 = vrot.slane %v473_v61, 1 }
 0x10d   : > { %v475_v63 = vadd.f32 %v474_v62, %v473_v61 }
 0x10f   : > { %v477_v0 = vmul.f32 0.015625, %v475_v63 }
 0x111   : > { %v478_v1 = vsub.f32 %v424_v25, %v477_v0  ;;  %v479_v2 = vsub.f32 %v427_v29, %v477_v0  ;;  %v480_v3 = vsub.f32 %v432_v28, %v477_v0  ;;  %v481_v4 = vsub.f32 %v435_v32, %v477_v0 }
 0x112   : > { %v482_v5 = vsub.f32 %v440_v43, %v477_v0  ;;  %v483_v6 = vsub.f32 %v443_v49, %v477_v0  ;;  %v484_v7 = vsub.f32 %v448_v47, %v477_v0  ;;  %v485_v8 = vsub.f32 %v451_v51, %v477_v0 }
 0x113   : > { %v486_v9 = vmul.f32 %v478_v1, %v478_v1  ;;  %v487_v10 = vmul.f32 %v479_v2, %v479_v2  ;;  %v488_v11 = vmul.f32 %v480_v3, %v480_v3  ;;  %v489_v12 = vmul.f32 %v481_v4, %v481_v4 }
 0x114   : > { %v490_v16 = vmul.f32 %v482_v5, %v482_v5  ;;  %v491_v22 = vmul.f32 %v483_v6, %v483_v6  ;;  %v492_v26 = vmul.f32 %v484_v7, %v484_v7  ;;  %v493_v29 = vmul.f32 %v485_v8, %v485_v8 }
 0x115   : > { %v494_v13 = vsel %vm454_vm4, %v486_v9, 0.0  ;;  %v495_v14 = vsel %vm454_vm4, %v487_v10, 0.0  ;;  %v497_v17 = vsel %vm454_vm4, %v488_v11, 0.0  ;;  %v499_v24 = vsel %vm454_vm4, %v489_v12, 0.0 }
 0x116   : > { %v496_v15 = vadd.f32 %v495_v14, %v494_v13  ;;  %v501_v27 = vsel %vm454_vm4, %v490_v16, 0.0  ;;  %v503_v31 = vsel %vm454_vm4, %v491_v22, 0.0  ;;  %v505_v33 = vsel %vm454_vm4, %v492_v26, 0.0 }
 0x117   : > { %v507_v37 = vsel %vm454_vm4, %v493_v29, 0.0  ;;  %v535_v49 = vstv %s526_s30  ;;  %v675_v12 = vadd.f32 %v797_v48, %v1011_v34  ;;  %v686_v13 = vadd.f32 %v1013_v36, %v797_v48 }
 0x118   : > { %v498_v20 = vadd.f32 %v497_v17, %v496_v15  ;;  %v678_v17 = vadd.f32 %v797_v48, %v1016_v39 }
 0x11a   : > { %v500_v25 = vadd.f32 %v499_v24, %v498_v20 }
 0x11c   : > { %v502_v28 = vadd.f32 %v501_v27, %v500_v25 }
 0x11e   : > { %v504_v32 = vadd.f32 %v503_v31, %v502_v28 }
 0x120   : > { %v506_v35 = vadd.f32 %v505_v33, %v504_v32 }
 0x122   : > { %v508_v38 = vadd.f32 %v507_v37, %v506_v35 }
 0x124   : > { %v509_v40 = vrot.slane %v508_v38, 4 }
 0x126   : > { %v510_v41 = vadd.f32 %v509_v40, %v508_v38 }
 0x128   : > { %v511_v42 = vrot.slane %v510_v41, 2 }
 0x12a   : > { %v512_v43 = vadd.f32 %v511_v42, %v510_v41 }
 0x12c   : > { %v513_v44 = vrot.slane %v512_v43, 1 }
 0x12e   : > { %v514_v45 = vadd.f32 %v513_v44, %v512_v43 }
 0x130   : > { %v515_v46 = vmul.f32 0.015625, %v514_v45 }
 0x132   : > { %v516_v47 = vadd.f32 1e-05, %v515_v46 }
 0x134   : > { %888 = vrsqrt.f32 %v516_v47 }
 0x13e   : > { %v889_v51 = vpop.eup %888 }
 0x13f   : > { %v523_v56 = vmul.f32 %v889_v51, %v483_v6  ;;  %v520_v57 = vmul.f32 %v889_v51, %v480_v3  ;;  %v518_v58 = vmul.f32 %v889_v51, %v478_v1  ;;  %v521_v59 = vmul.f32 %v889_v51, %v481_v4 }
 0x140   : > { %v519_v60 = vmul.f32 %v889_v51, %v479_v2  ;;  %v524_v61 = vmul.f32 %v889_v51, %v484_v7  ;;  %v522_v62 = vmul.f32 %v889_v51, %v482_v5  ;;  %v525_v63 = vmul.f32 %v889_v51, %v485_v8 }
 0x141   : > { %vm529_vm5 = vcmp.gt.f32.partialorder %v520_v57, 0.0  ;;  %v538_v18 = vmul.f32 %v535_v49, %v520_v57  ;;  %vm527_vm6 = vcmp.gt.f32.partialorder %v518_v58, 0.0  ;;  %v536_v0 = vmul.f32 %v535_v49, %v518_v58 }
 0x142   : > { %vm530_vm7 = vcmp.gt.f32.partialorder %v521_v59, 0.0  ;;  %v539_v19 = vmul.f32 %v535_v49, %v521_v59  ;;  %vm528_vm8 = vcmp.gt.f32.partialorder %v519_v60, 0.0  ;;  %v537_v21 = vmul.f32 %v535_v49, %v519_v60 }
 0x143   : > { %v546_v23 = vsel %vm529_vm5, %v520_v57, %v538_v18  ;;  %v544_v30 = vsel %vm527_vm6, %v518_v58, %v536_v0  ;;  %vm533_vm9 = vcmp.gt.f32.partialorder %v524_v61, 0.0  ;;  %v542_v1 = vmul.f32 %v535_v49, %v524_v61 }
 0x144   : > { %v691_v2 = vadd.f32 %v667_v50, %v546_v23  ;;  %v689_v3 = vadd.f32 %v659_v52, %v544_v30  ;;  %v547_v4 = vsel %vm530_vm7, %v521_v59, %v539_v19  ;;  %v545_v5 = vsel %vm528_vm8, %v519_v60, %v537_v21 }
 0x145   : > { %v692_v6 = vadd.f32 %v670_v53, %v547_v4  ;;  %v690_v7 = vadd.f32 %v662_v54, %v545_v5  ;;  %v550_v8 = vsel %vm533_vm9, %v524_v61, %v542_v1  ;;  %vm531_vm10 = vcmp.gt.f32.partialorder %v522_v62, 0.0 }
 0x146   : > { %699 = vst.msk [vmem:[%s1043_s13 + $0x10] sm:$0xff] %vm454_vm4, %v691_v2  ;;  %697 = vst.msk [vmem:[%s1043_s13] sm:$0xff] %vm454_vm4, %v689_v3  ;;  %v695_v9 = vadd.f32 %v683_v55, %v550_v8  ;;  %v540_v10 = vmul.f32 %v535_v49, %v522_v62  ;;  %vm534_vm11 = vcmp.gt.f32.partialorder %v525_v63, 0.0  ;;  %v543_v11 = vmul.f32 %v535_v49, %v525_v63 }
 0x147   : > { %700 = vst.msk [vmem:[%s1043_s13 + $0x18] sm:$0xff] %vm454_vm4, %v692_v6  ;;  %698 = vst.msk [vmem:[%s1043_s13 + $0x8] sm:$0xff] %vm454_vm4, %v690_v7  ;;  %vm532_vm12 = vcmp.gt.f32.partialorder %v523_v56, 0.0  ;;  %v541_v14 = vmul.f32 %v535_v49, %v523_v56 }
 0x148   : > { %703 = vst.msk [vmem:[%s1043_s13 + $0x30] sm:$0xff] %vm454_vm4, %v695_v9  ;;  %v548_v15 = vsel %vm531_vm10, %v522_v62, %v540_v10  ;;  %v551_v16 = vsel %vm534_vm11, %v525_v63, %v543_v11 }
 0x149   : > { %v693_v20 = vadd.f32 %v675_v12, %v548_v15  ;;  %v696_v22 = vadd.f32 %v686_v13, %v551_v16  ;;  %v549_v24 = vsel %vm532_vm12, %v523_v56, %v541_v14 }
 0x14a   : > { %v694_v25 = vadd.f32 %v678_v17, %v549_v24 }
 0x14b   : > { %701 = vst.msk [vmem:[%s1043_s13 + $0x20] sm:$0xff] %vm454_vm4, %v693_v20  ;;  %704 = vst.msk [vmem:[%s1043_s13 + $0x38] sm:$0xff] %vm454_vm4, %v696_v22 }
 0x14c   : > { %702 = vst.msk [vmem:[%s1043_s13 + $0x28] sm:$0xff] %vm454_vm4, %v694_v25 }
 0x14d PF: > { %s18_s26 = sadd.s32 1, %s896_s26  }
 0x14e   : > { %p15_p4 = scmp.ge.s32.totalorder %s18_s26, 4  }
 0x150   :  { %17 = sbr.rel (!%p15_p4) target bundleno = 2 (0x2), region = 81 }

// kernel: _lambda_.7
= control target key start
LH: loop header
LB: loop body
LE: loop exit
PB: predicated region body
PF: predicated region fallthrough
CT: control target
= control target key end

     0   :  { %s491_s17 = smov 0   ;;  %s536_s0 = inlined_call_operand.vmem [shape: bf16[2,16,72], index: 0, kind: input, shape index: {}]   ;;  %s537_s1 = inlined_call_operand.vmem [shape: bf16[72,16], index: 1, kind: input, shape index: {}]   ;;  %s538_s2 = inlined_call_operand.vmem [shape: f32[1,16], index: 2, kind: input, shape index: {}]   ;;  %s539_s3 = inlined_call_operand.<no memory space> [shape: f32[1,1], index: 3, kind: input, shape index: {}]   ;;  %s540_s4 = inlined_call_operand.vmem [shape: f32[2,16,16], index: 4, kind: output, shape index: {}]  }
   0x1   :  { %9 = sst [smem:[#allocation2]] %s539_s3 }
   0x2 LB: > { %s394_s18 = sadd.s32 4294967295, %s459_s17   ;;  %p398_p0 = scmp.ge.s32.totalorder %s459_s17, 1  ;;  %s459_s17 = sphi %s491_s17, %s15_s17  }
   0x3   : > { %p163_p1 = scmp.lt.s32.totalorder %s459_s17, 3 }
   0x5   : > { %p164_p2 = pnand %p398_p0, %p163_p1 }
   0x6   : > { %v445_v0 = vld [vmem:[%s537_s1] sm:$0xff] (!%p164_p2)   ;;  %v461_v1 = vmov (!%p164_p2), 0.0   ;;  %v446_v2 = vld [vmem:[%s537_s1 + $0x8] sm:$0xff] (!%p164_p2)   ;;  %vm462_vm0 = vmmov (!%p164_p2), 0   ;;  %p189_p3 = scmp.lt.s32.totalorder (!%p164_p2), %s394_s18, 1  ;;  %v447_v3 = vld [vmem:[%s537_s1 + $0x10] sm:$0xff] (!%p164_p2)  }
   0x7   : > { %167 = sbr.rel (%p164_p2) target bundleno = 300 (0x12c), region = 36  ;;  %421 = vmatprep.subr.bf16.mxu0 (!%p164_p2), %v461_v1  ;;  %431 = vmatprep.mubr.msk.bf16.mxu0 (!%p164_p2), %vm462_vm0, %v461_v1  ;;  %v448_v4 = vld [vmem:[%s537_s1 + $0x18] sm:$0xff] (!%p164_p2)   ;;  %v449_v5 = vld [vmem:[%s537_s1 + $0x20] ss:$0 sps:$4 sm:$0xff] (!%p164_p2)   ;;  %vm254_vm1 = vcmask (!%p164_p2), 1043456   ;;  %vm250_vm2 = vcmask (!%p164_p2), 588800  }
   0x8   : > { %422 = vmatpush3.bf16.msra.mxu0 (!%p164_p2), %v445_v0  ;;  %v256_v6 = vsel (!%p164_p2), %vm254_vm1, %v449_v5, 0  ;;  %v403_v8 = vld [vmem:[%s538_s2] ss:$0 sm:$0xff] (!%p164_p2)  ;;  %vm299_vm3 = vcmask (!%p164_p2), 130048   ;;  %s329_s8 = sld [smem:[#allocation2]] (!%p164_p2) }
   0x9   : > { %423 = vmatprep.subr.bf16.mxu0 (!%p164_p2), %v461_v1 }
   0xc   : > { %424 = vmatpush3.bf16.msra.mxu0 (!%p164_p2), %v446_v2 }
   0xd   : > { %425 = vmatprep.subr.bf16.mxu0 (!%p164_p2), %v461_v1 }
   0xe   : > { %s542_s18 = smov (!%p189_p3, %s394_s18), 1  ;;  %v332_v41 = vstv %s329_s8 }
   0xf   : > { %s413_s24 = sshll.u32 %s542_s18, 3  ;;  %s414_s9 = sshll.u32 %s542_s18, 4 }
  0x10   : > { %s193_s27 = scalar_lea.vmem %s536_s0, %s413_s24  ;;  %426 = vmatpush3.bf16.msra.mxu0 %v447_v3  ;;  %s198_s12 = scalar_lea.vmem %s540_s4, %s414_s9 }
  0x11   : > { %427 = vmatprep.subr.bf16.mxu0 %v461_v1  ;;  %v450_v7 = vld [vmem:[%s193_s27] sm:$0xff]  }
  0x14   : > { %428 = vmatpush3.bf16.msra.mxu0 %v448_v4 }
  0x15   : > { %429 = vmatprep.subr.bf16.mxu0 %v461_v1 }
  0x18   : > { %430 = vmatpush3.bf16.msra.mxu0 %v256_v6 }
  0x1b   : > { %432 = vmatmul.mubr.msk.bf16.vlgmr.msra.gmra.mrb[0].mxu0 %vm250_vm2, %v450_v7 }
  0xee   : > { %v292_v9 = vpop.f32.mrb[0].mxu0 }
  0xef   : > { %v293_v10 = vadd.f32 %v403_v8, %v292_v9  ;;  %v433_v11 = vpop.f32.mrb[1].mxu0 }
  0xf0   : > { %v295_v12 = vpop.f32.mrb[2].mxu0 }
  0xf1   : > { %v296_v13 = vadd.f32 %v403_v8, %v295_v12  ;;  %v434_v14 = vpop.f32.mrb[3].mxu0  ;;  %v300_v15 = vsel %vm299_vm3, %v293_v10, 0.0 }
  0xf3   : > { %v301_v16 = vsel %vm299_vm3, %v296_v13, 0.0 }
  0xf4   : > { %v302_v17 = vadd.f32 %v301_v16, %v300_v15 }
  0xf6   : > { %v303_v18 = vrot.slane %v302_v17, 4 }
  0xf8   : > { %v304_v19 = vadd.f32 %v303_v18, %v302_v17 }
  0xfa   : > { %v305_v20 = vrot.slane %v304_v19, 2 }
  0xfc   : > { %v306_v21 = vadd.f32 %v305_v20, %v304_v19 }
  0xfe   : > { %v307_v22 = vrot.slane %v306_v21, 1 }
 0x100   : > { %v308_v23 = vadd.f32 %v307_v22, %v306_v21 }
 0x102   : > { %v310_v24 = vmul.f32 0.0625, %v308_v23 }
 0x104   : > { %v311_v25 = vsub.f32 %v293_v10, %v310_v24  ;;  %v312_v26 = vsub.f32 %v296_v13, %v310_v24 }
 0x106   : > { %v313_v27 = vmul.f32 %v311_v25, %v311_v25  ;;  %v314_v28 = vmul.f32 %v312_v26, %v312_v26 }
 0x108   : > { %v315_v29 = vsel %vm299_vm3, %v313_v27, 0.0  ;;  %v316_v30 = vsel %vm299_vm3, %v314_v28, 0.0 }
 0x109   : > { %v317_v31 = vadd.f32 %v316_v30, %v315_v29 }
 0x10b   : > { %v318_v32 = vrot.slane %v317_v31, 4 }
 0x10d   : > { %v319_v33 = vadd.f32 %v318_v32, %v317_v31 }
 0x10f   : > { %v320_v34 = vrot.slane %v319_v33, 2 }
 0x111   : > { %v321_v35 = vadd.f32 %v320_v34, %v319_v33 }
 0x113   : > { %v322_v36 = vrot.slane %v321_v35, 1 }
 0x115   : > { %v323_v37 = vadd.f32 %v322_v36, %v321_v35 }
 0x117   : > { %v324_v38 = vmul.f32 0.0625, %v323_v37 }
 0x119   : > { %v325_v39 = vadd.f32 1e-05, %v324_v38 }
 0x11b   : > { %451 = vrsqrt.f32 %v325_v39 }
 0x125   : > { %v452_v40 = vpop.eup %451 }
 0x126   : > { %v327_v42 = vmul.f32 %v452_v40, %v311_v25  ;;  %v328_v43 = vmul.f32 %v452_v40, %v312_v26 }
 0x128   : > { %vm330_vm4 = vcmp.gt.f32.partialorder %v327_v42, 0.0  ;;  %vm331_vm5 = vcmp.gt.f32.partialorder %v328_v43, 0.0  ;;  %v333_v44 = vmul.f32 %v332_v41, %v327_v42  ;;  %v334_v45 = vmul.f32 %v332_v41, %v328_v43 }
 0x12a   : > { %v335_v46 = vsel %vm330_vm4, %v327_v42, %v333_v44  ;;  %v336_v47 = vsel %vm331_vm5, %v328_v43, %v334_v45 }
 0x12b   : > { %337 = vst.msk [vmem:[%s198_s12] sm:$0xff] %vm299_vm3, %v335_v46  ;;  %338 = vst.msk [vmem:[%s198_s12 + $0x8] sm:$0xff] %vm299_vm3, %v336_v47 }
 0x12c PF: > { %s15_s17 = sadd.s32 1, %s459_s17  }
 0x12d   : > { %p12_p4 = scmp.ge.s32.totalorder %s15_s17, 4  }
 0x12f   :  { %14 = sbr.rel (!%p12_p4) target bundleno = 2 (0x2), region = 66 }

// kernel: _lambda_.8
= control target key start
LH: loop header
LB: loop body
LE: loop exit
PB: predicated region body
PF: predicated region fallthrough
CT: control target
= control target key end

     0   :  { %s716_s21 = smov 0   ;;  %s799_s0 = inlined_call_operand.vmem [shape: bf16[2,16,144], index: 0, kind: input, shape index: {}]   ;;  %s800_s1 = inlined_call_operand.vmem [shape: bf16[144,16], index: 1, kind: input, shape index: {}]   ;;  %s801_s2 = inlined_call_operand.vmem [shape: f32[1,16], index: 2, kind: input, shape index: {}]   ;;  %s802_s3 = inlined_call_operand.vmem [shape: bf16[2,16,72], index: 3, kind: input, shape index: {}]   ;;  %s803_s4 = inlined_call_operand.vmem [shape: bf16[72,16], index: 4, kind: input, shape index: {}]   ;;  %s804_s5 = inlined_call_operand.vmem [shape: f32[1,16], index: 5, kind: input, shape index: {}]   ;;  %s805_s6 = inlined_call_operand.vmem [shape: f32[2,16,16], index: 6, kind: output, shape index: {}]  }
   0x1 LB: > { %s578_s22 = sadd.s32 4294967295, %s676_s21   ;;  %p582_p0 = scmp.ge.s32.totalorder %s676_s21, 1  ;;  %s676_s21 = sphi %s716_s21, %s16_s21  }
   0x2   : > { %p222_p1 = scmp.lt.s32.totalorder %s676_s21, 3 }
   0x4   : > { %p223_p2 = pnand %p582_p0, %p222_p1 }
   0x5   : > { %v652_v0 = vld [vmem:[%s800_s1] sm:$0xff] (!%p223_p2)   ;;  %v678_v1 = vmov (!%p223_p2), 0   ;;  %v653_v2 = vld [vmem:[%s800_s1 + $0x8] sm:$0xff] (!%p223_p2)   ;;  %v679_v3 = vmov (!%p223_p2), 0.0   ;;  %p257_p3 = scmp.lt.s32.totalorder (!%p223_p2), %s578_s22, 1  ;;  %v654_v5 = vld [vmem:[%s800_s1 + $0x10] sm:$0xff] (!%p223_p2)  }
   0x6   : > { %226 = sbr.rel (%p223_p2) target bundleno = 263 (0x107), region = 44  ;;  %367 = vmatprep.subr.bf16.mxu1 (!%p223_p2), %v678_v1  ;;  %621 = vmatprep.subr.bf16.mxu0 (!%p223_p2), %v679_v3  ;;  %v657_v4 = vld [vmem:[%s803_s4] sm:$0xff] (!%p223_p2)   ;;  %v659_v6 = vld [vmem:[%s803_s4 + $0x8] sm:$0xff] (!%p223_p2)   ;;  %vm680_vm0 = vmmov (!%p223_p2), 0   ;;  %v655_v7 = vld [vmem:[%s800_s1 + $0x18] sm:$0xff] (!%p223_p2)   ;;  %vm363_vm1 = vcmask (!%p223_p2), 130048  }
   0x7   : > { %368 = vmatpush1.bf16.msra.mxu1 (!%p223_p2), %v652_v0  ;;  %622 = vmatpush3.bf16.msra.mxu0 (!%p223_p2), %v657_v4  ;;  %v661_v8 = vld [vmem:[%s803_s4 + $0x10] sm:$0xff] (!%p223_p2)   ;;  %v656_v9 = vld [vmem:[%s800_s1 + $0x20] sm:$0xff] (!%p223_p2)   ;;  %v663_v11 = vld [vmem:[%s803_s4 + $0x18] sm:$0xff] (!%p223_p2)   ;;  %vm462_vm2 = vcmask (!%p223_p2), 1043456   ;;  %vm458_vm3 = vcmask (!%p223_p2), 588800  }
   0x8   : > { %369 = vmatprep.subr.bf16.mxu1 (!%p223_p2), %v678_v1  ;;  %623 = vmatprep.subr.bf16.mxu0 (!%p223_p2), %v679_v3  ;;  %v665_v12 = vld [vmem:[%s803_s4 + $0x20] ss:$0 sps:$4 sm:$0xff] (!%p223_p2)   ;;  %v658_v13 = vld [vmem:[%s800_s1 + $0x28] sm:$0xff] (!%p223_p2)   ;;  %v660_v15 = vld [vmem:[%s800_s1 + $0x30] sm:$0xff] (!%p223_p2)  }
   0x9   : > { %631 = vmatprep.mubr.msk.bf16.mxu0 (!%p223_p2), %vm680_vm0, %v679_v3  ;;  %v464_v14 = vsel (!%p223_p2), %vm462_vm2, %v665_v12, 0  ;;  %v662_v17 = vld [vmem:[%s800_s1 + $0x38] sm:$0xff] (!%p223_p2)   ;;  %v664_v18 = vld [vmem:[%s800_s1 + $0x40] sm:$0xff] (!%p223_p2)  }
   0xa   : > { %v589_v24 = vld [vmem:[%s801_s2] ss:$0 sm:$0xff] (!%p223_p2) }
   0xb   : > { %370 = vmatpush1.bf16.msra.mxu1 (!%p223_p2), %v653_v2  ;;  %624 = vmatpush3.bf16.msra.mxu0 (!%p223_p2), %v659_v6  ;;  %v602_v26 = vld [vmem:[%s804_s5] ss:$0 sm:$0xff] (!%p223_p2) }
   0xc   : > { %371 = vmatprep.subr.bf16.mxu1 (!%p223_p2), %v678_v1  ;;  %625 = vmatprep.subr.bf16.mxu0 (!%p223_p2), %v679_v3 }
   0xd   : > { %s807_s22 = smov (!%p257_p3, %s578_s22), 1 }
   0xe   : > { %s612_s9 = sshll.u32 %s807_s22, 4  ;;  %s613_s17 = sshll.u32 %s807_s22, 3 }
   0xf   : > { %372 = vmatpush1.bf16.msra.mxu1 %v654_v5  ;;  %s753_s16 = scalar_lea.vmem %s799_s0, %s612_s9  ;;  %s266_s24 = scalar_lea.vmem %s802_s3, %s613_s17  ;;  %626 = vmatpush3.bf16.msra.mxu0 %v661_v8 }
  0x10   : > { %373 = vmatprep.subr.bf16.mxu1 %v678_v1  ;;  %v668_v10 = vld [vmem:[%s753_s16 + $0x4] ss:$8 sps:$4 sm:$0xff]   ;;  %627 = vmatprep.subr.bf16.mxu0 %v679_v3  ;;  %v666_v19 = vld [vmem:[%s753_s16] ss:$8 sps:$4 sm:$0xff]   ;;  %s271_s20 = scalar_lea.vmem %s805_s6, %s612_s9 }
  0x11   : > { %601 = vmatprep.mubr.msk.bf16.mxu1 %vm363_vm1, %v668_v10  ;;  %v669_v16 = vld [vmem:[%s266_s24] sm:$0xff]  }
  0x13   : > { %374 = vmatpush1.bf16.msra.mxu1 %v655_v7  ;;  %628 = vmatpush3.bf16.msra.mxu0 %v663_v11 }
  0x14   : > { %375 = vmatprep.subr.bf16.mxu1 %v678_v1  ;;  %629 = vmatprep.subr.bf16.mxu0 %v679_v3 }
  0x17   : > { %376 = vmatpush1.bf16.msra.mxu1 %v656_v9  ;;  %630 = vmatpush3.bf16.msra.mxu0 %v464_v14 }
  0x18   : > { %377 = vmatprep.subr.bf16.mxu1 %v678_v1 }
  0x1a   : > { %632 = vmatmul.mubr.msk.bf16.vlgmr.msra.gmra.mrb[0].mxu0 %vm458_vm3, %v669_v16 }
  0x1b   : > { %378 = vmatpush1.bf16.msra.mxu1 %v658_v13 }
  0x1c   : > { %379 = vmatprep.subr.bf16.mxu1 %v678_v1 }
  0x1f   : > { %380 = vmatpush1.bf16.msra.mxu1 %v660_v15 }
  0x20   : > { %381 = vmatprep.subr.bf16.mxu1 %v678_v1 }
  0x23   : > { %382 = vmatpush1.bf16.msra.mxu1 %v662_v17 }
  0x24   : > { %383 = vmatprep.subr.bf16.mxu1 %v678_v1 }
  0x27   : > { %384 = vmatpush1.bf16.msra.mxu1 %v664_v18 }
  0x2a   : > { %400 = vmatmul.mubr.bf16.vlgmr.msra.gmra.mrb[0].mxu1 %v666_v19 }
  0xed   : > { %v500_v20 = vpop.f32.mrb[0].mxu0 }
  0xee   : > { %v633_v21 = vpop.f32.mrb[1].mxu0 }
  0xef   : > { %v503_v22 = vpop.f32.mrb[2].mxu0 }
  0xf0   : > { %v634_v23 = vpop.f32.mrb[3].mxu0 }
  0xfd   : > { %v401_v25 = vpop.f32.mrb[0].mxu1 }
  0xfe   : > { %v402_v27 = vadd.f32 %v589_v24, %v401_v25  ;;  %v403_v28 = vpop.f32.mrb[1].mxu1 }
  0xff   : > { %v404_v29 = vpop.f32.mrb[2].mxu1 }
 0x100   : > { %v636_v30 = vadd.f32 %v602_v26, %v402_v27  ;;  %v405_v31 = vadd.f32 %v589_v24, %v404_v29  ;;  %v406_v32 = vpop.f32.mrb[3].mxu1 }
 0x102   : > { %v637_v33 = vadd.f32 %v636_v30, %v500_v20  ;;  %v639_v34 = vadd.f32 %v602_v26, %v405_v31 }
 0x104   : > { %509 = vst.msk [vmem:[%s271_s20] sm:$0xff] %vm363_vm1, %v637_v33  ;;  %v640_v35 = vadd.f32 %v639_v34, %v503_v22 }
 0x106   : > { %510 = vst.msk [vmem:[%s271_s20 + $0x8] sm:$0xff] %vm363_vm1, %v640_v35 }
 0x107 PF: > { %s16_s21 = sadd.s32 1, %s676_s21  }
 0x108   : > { %p13_p4 = scmp.ge.s32.totalorder %s16_s21, 4  }
 0x10a   :  { %15 = sbr.rel (!%p13_p4) target bundleno = 1 (0x1), region = 77 }

// kernel: _lambda_.9
= control target key start
LH: loop header
LB: loop body
LE: loop exit
PB: predicated region body
PF: predicated region fallthrough
CT: control target
= control target key end

     0   :  { %v288_v6 = vmov 1966171168   ;;  %v67_v8 = vlaneseq  ;;  %s366_s1 = inlined_call_operand.vmem [shape: bf16[256,128], index: 1, kind: input, shape index: {}]   ;;  %s367_s0 = inlined_call_operand.vmem [shape: bf16[2,256], index: 0, kind: input, shape index: {}]   ;;  %s368_s2 = inlined_call_operand.vmem [shape: f32[1,128], index: 2, kind: input, shape index: {}]   ;;  %s369_s3 = inlined_call_operand.vmem [shape: f32[2,128], index: 3, kind: output, shape index: {}]  }
   0x1   :  { %v268_v0 = vld [vmem:[%s366_s1 + $0x40] sm:$0xff]   ;;  %v270_v2 = vld [vmem:[%s366_s1 + $0x48] sm:$0xff]   ;;  %v272_v4 = vld [vmem:[%s366_s1 + $0x50] sm:$0xff]   ;;  %v65_v7 = vunpack.c.l.s4 %v288_v6 }
   0x2   :  { %v269_v1 = vld [vmem:[%s366_s1] sm:$0xff]   ;;  %245 = vmatprep.subr.bf16.mxu0 %v268_v0  ;;  %v271_v3 = vld [vmem:[%s366_s1 + $0x8] sm:$0xff]   ;;  %v273_v5 = vld [vmem:[%s366_s1 + $0x10] sm:$0xff]   ;;  %v68_v12 = vshrl.u32 %v67_v8, 7 }
   0x3   :  { %246 = vmatpush3.bf16.msra.mxu0 %v269_v1  ;;  %v274_v9 = vld [vmem:[%s366_s1 + $0x58] sm:$0xff]   ;;  %v66_v11 = vunpack.c.0.s8 %v65_v7  ;;  %v276_v13 = vld [vmem:[%s366_s1 + $0x60] sm:$0xff]   ;;  %v278_v16 = vld [vmem:[%s366_s1 + $0x68] sm:$0xff]  }
   0x4   :  { %247 = vmatprep.subr.bf16.mxu0 %v270_v2  ;;  %v275_v10 = vld [vmem:[%s366_s1 + $0x18] sm:$0xff]   ;;  %v277_v14 = vld [vmem:[%s366_s1 + $0x20] sm:$0xff]   ;;  %v279_v19 = vld [vmem:[%s366_s1 + $0x28] sm:$0xff]  }
   0x5   :  { %v69_v15 = vsub.s32 %v66_v11, %v68_v12  ;;  %v228_v17 = vld.sshfl [vmem:[%s367_s0] sm:$0x11 pattern:$0x75316420]  ;;  %v280_v21 = vld [vmem:[%s366_s1 + $0x70] sm:$0xff]   ;;  %v282_v23 = vld [vmem:[%s366_s1 + $0x78] sm:$0xff]  }
   0x6   :  { %v63_v18 = vcombine.high %v228_v17, %v228_v17  ;;  %v281_v22 = vld [vmem:[%s366_s1 + $0x30] sm:$0xff]   ;;  %v283_v24 = vld [vmem:[%s366_s1 + $0x38] sm:$0xff]   ;;  %v227_v27 = vld [vmem:[%s368_s2] ss:$0 sm:$0xff] }
   0x7   :  { %248 = vmatpush3.bf16.msra.mxu0 %v271_v3  ;;  %v70_v25 = vrot.slane %v228_v17, %v69_v15 }
   0x8   :  { %249 = vmatprep.subr.bf16.mxu0 %v272_v4  ;;  %v77_v20 = vrot.slane %v63_v18, %v69_v15 }
   0xa   :  { %208 = vmatprep.mubr.bf16.mxu0 %v77_v20 }
   0xb   :  { %250 = vmatpush3.bf16.msra.mxu0 %v273_v5 }
   0xc   :  { %251 = vmatprep.subr.bf16.mxu0 %v274_v9 }
   0xf   :  { %252 = vmatpush3.bf16.msra.mxu0 %v275_v10 }
  0x10   :  { %253 = vmatprep.subr.bf16.mxu0 %v276_v13 }
  0x13   :  { %254 = vmatpush3.bf16.msra.mxu0 %v277_v14 }
  0x14   :  { %255 = vmatprep.subr.bf16.mxu0 %v278_v16 }
  0x17   :  { %256 = vmatpush3.bf16.msra.mxu0 %v279_v19 }
  0x18   :  { %257 = vmatprep.subr.bf16.mxu0 %v280_v21 }
  0x1b   :  { %258 = vmatpush3.bf16.msra.mxu0 %v281_v22 }
  0x1c   :  { %259 = vmatprep.subr.bf16.mxu0 %v282_v23 }
  0x1f   :  { %260 = vmatpush3.bf16.msra.mxu0 %v283_v24 }
  0x22   :  { %209 = vmatmul.mubr.bf16.vlgmr.msra.gmra.mrb[0].mxu0 %v70_v25 }
  0xf5   :  { %v261_v26 = vpop.f32.mrb[0].mxu0 }
  0xf6   :  { %v262_v28 = vpop.f32.mrb[1].mxu0 }
  0xf7   :  { %v263_v29 = vadd.f32 %v262_v28, %v261_v26  ;;  %v264_v30 = vpop.f32.mrb[2].mxu0 }
  0xf8   :  { %v265_v31 = vpop.f32.mrb[3].mxu0 }
  0xf9   :  { %v211_v32 = vadd.f32 %v263_v29, %v227_v27 }
  0xfb   :  { %v216_v33 = vsub.f32 0.0, %v211_v32 }
  0xfd   :  { %v217_v34 = vmul.f32 1.442695, %v216_v33 }
  0xff   :  { %284 = vpow2.f32 %v217_v34 }
 0x109   :  { %v285_v35 = vpop.eup %284 }
 0x10a   :  { %v219_v36 = vadd.f32 1.0, %v285_v35 }
 0x10c   :  { %286 = vrcp.f32 %v219_v36 }
 0x116   :  { %v287_v37 = vpop.eup %286 }
 0x117   :  { %222 = vst [vmem:[%s369_s3] sm:$0x3] %v287_v37 }

</bundles_post_ra>
